<compile_context>
chip_gen: v6e
topology: v6e:2x2x1
jax: 0.10.0
libtpu: 0.0.40
codegen_flags: <defaults>
</compile_context>

<pallas_src>
import functools
import math

import jax
import jax.numpy as jnp
from jax.experimental import pallas as pl
from jax.experimental.pallas import tpu as pltpu


# ----------------------------------------------------------------------------
# The single fused kernel
# ----------------------------------------------------------------------------
def _nerf_flows_kernel(*refs, split_in, nf):
    """Inputs (all whole-array VMEM blocks), in order:
         pts_t (ic,BN), views_t (icv,BN),
         per pts layer: (w_pts_t, w_h_t, b) if its input is the skip concat else (w_t, b),
         wha_t, bha, wf_t, bf, wvf_t, wvv_t, bv, whr_t, bhr,
         wca_t, bca, wcr_t, bcr,               # packed flow amortization linears
         Rb (BN,B), Rk (K,B),                  # one-hot lane-replication matrices
         mean_c (4,1), std_c (4,1),            # rows [rgb0,rgb1,rgb2,alpha]
         eps_t (4,K)
       Output o_ref (8, B):
         rows 0..2 = z_k_rgb, row 3 = z_k_alpha, row 4 = loss_entropy (broadcast),
         rows 5..7 = 0.   Column ordering is c = k*BN + b.
    """
    o_ref = refs[-1]
    it = iter(refs[:-1])
    take = lambda: next(it)[...]
    f32 = jnp.float32
    dot = lambda a, b: jnp.dot(a, b, preferred_element_type=f32)

    pts_t = take()                      # (ic, BN)
    views_t = take()                    # (icv, BN)

    # ---- encode MLP, transposed layout (features on sublanes, BN on lanes) ----
    h = pts_t
    for use_skip in split_in:
        if use_skip:                    # logical input is cat([input_pts, h]) -> split W
            w_p, w_h, b = take(), take(), take()
            y = dot(w_p, pts_t) + dot(w_h, h)
        else:
            w, b = take(), take()
            y = dot(w, h)
        h = jnp.maximum(y + b, 0.0)

    wha_t, bha = take(), take()
    wf_t, bf = take(), take()
    wvf_t, wvv_t, bv = take(), take(), take()
    whr_t, bhr = take(), take()
    wca_t, bca = take(), take()
    wcr_t, bcr = take(), take()
    Rb = take()                         # (BN, B)
    Rk = take()                         # (K, B)
    mean_c = take()                     # (4, 1)
    std_c = take()                      # (4, 1)
    eps_t = take()                      # (4, K)

    h_alpha_t = dot(wha_t, h) + bha                                   # (ha, BN)
    feat_t = dot(wf_t, h) + bf                                        # (W, BN)
    hv_t = jnp.maximum(dot(wvf_t, feat_t) + dot(wvv_t, views_t) + bv, 0.0)
    h_rgb_t = dot(whr_t, hv_t) + bhr                                  # (hr, BN)

    # ---- amortization on BN columns only, then lane-replicate to B = BN*K ----
    amort_a = dot(dot(wca_t, h_alpha_t) + bca, Rb)                    # (OTa, B)
    amort_r = dot(dot(wcr_t, h_rgb_t) + bcr, Rb)                      # (OTr, B)

    # z0 = eps*std + mean, replicated so column k*BN+b only depends on k
    z0_full = dot(eps_t * std_c + mean_c, Rk)                         # (4, B)
    B = z0_full.shape[-1]

    def row_sum(v):                     # tiny static sublane sum via slice adds
        acc = v[0:1, :]
        for i in range(1, v.shape[0]):
            acc = acc + v[i:i + 1, :]
        return acc

    def run_flows(amort, z_rows, zs):
        d_sz, g_sz = nf * zs * zs, nf * zs
        diag_blk = jnp.tanh(amort[d_sz:d_sz + 2 * g_sz, :])           # one EUP pass
        z = list(z_rows)
        ld = jnp.zeros((1, B), f32)
        for k in range(nf):                                           # static unroll
            d1 = [diag_blk[i * nf + k:i * nf + k + 1, :] for i in range(zs)]
            d2 = [diag_blk[g_sz + i * nf + k:g_sz + i * nf + k + 1, :] for i in range(zs)]
            fd = lambda i, j: amort[(i * zs + j) * nf + k:(i * zs + j) * nf + k + 1, :]
            ab = lambda i: amort[d_sz + 2 * g_sz + i * nf + k:
                                 d_sz + 2 * g_sz + i * nf + k + 1, :]
            r1 = {(i, i): d1[i] for i in range(zs)}
            r2 = {(i, i): d2[i] for i in range(zs)}
            for i in range(zs):
                for j in range(i + 1, zs):
                    r1[(i, j)] = fd(i, j)
                    r2[(i, j)] = fd(j, i)
            perm = list(range(zs)) if k % 2 == 0 else list(range(zs - 1, -1, -1))
            z_per = [z[perm[j]] for j in range(zs)]
            pre = []
            for i in range(zs):
                acc = ab(i)
                for j in range(i, zs):            # r2 is upper triangular
                    acc = acc + r2[(i, j)] * z_per[j]
                pre.append(acc)
            hh_slab = jnp.tanh(pre[0] if zs == 1 else jnp.concatenate(pre, axis=0))
            hh = [hh_slab[i:i + 1, :] for i in range(zs)]
            z_new = []
            for i in range(zs):
                m = perm[i]
                acc = z[i]
                for j in range(m, zs):            # r1 is upper triangular
                    acc = acc + r1[(m, j)] * hh[j]
                z_new.append(acc)
            z = z_new
            dj = [1.0 + (1.0 - hh[i] * hh[i]) * (d1[i] * d2[i]) for i in range(zs)]
            dj_slab = dj[0] if zs == 1 else jnp.concatenate(dj, axis=0)
            # TODO(synk): like the torch reference, no epsilon inside log(abs(.)).
            ld = ld + row_sum(jnp.log(jnp.abs(dj_slab)))
        return z, ld

    z_a, ld_a = run_flows(amort_a, [z0_full[3:4, :]], 1)
    z_r, ld_r = run_flows(amort_r, [z0_full[i:i + 1, :] for i in range(3)], 3)

    z_slab = jnp.concatenate(z_r + z_a, axis=0)                       # (4, B) [rgb|alpha]
    # stable softplus over the whole slab in one pass
    sp = jnp.maximum(z_slab, 0.0) + jnp.log(1.0 + jnp.exp(-jnp.abs(z_slab)))
    sldj_a = ld_a + z_slab[3:4, :] - sp[3:4, :]
    sldj_r = ld_r + row_sum(z_slab[0:3, :]) - 2.0 * row_sum(sp[0:3, :])

    # base log-normal terms: -0.5*(2*log(std) + (z0-mean)^2/std^2)
    base = -0.5 * (2.0 * jnp.log(std_c) + (z0_full - mean_c) ** 2 / (std_c * std_c))

    def mean_all(v):
        s = row_sum(jnp.sum(v, axis=1, keepdims=True))
        return s * (1.0 / (v.shape[0] * v.shape[1]))

    loss = (mean_all(base[3:4, :]) - mean_all(sldj_a)
            + mean_all(base[0:3, :]) - mean_all(sldj_r))              # (1, 1)

    o_ref[0:4, :] = z_slab
    o_ref[4:5, :] = jnp.broadcast_to(loss, (1, B))
    o_ref[5:8, :] = jnp.zeros((3, B), f32)


# ----------------------------------------------------------------------------
# One-time parameter packing (hoisted OUT of the jitted forward)
# ----------------------------------------------------------------------------
def pack_inputs(params, cfg, BN):
    ic = cfg["input_ch"]
    K = cfg["K_samples"]
    B = BN * K
    skips = set(cfg["skips"])
    n_pts = len(params["pts_linears"])
    assert (n_pts - 1) not in skips, "last pts layer must not be a skip layer"

    packed = []
    for i, (w, b) in enumerate(params["pts_linears"]):
        if (i - 1) in skips:                      # input is cat([input_pts, h])
            packed += [w[:ic, :].T, w[ic:, :].T, b.reshape(-1, 1)]
        else:
            packed += [w.T, b.reshape(-1, 1)]

    wha, bha = params["h_alpha_linear"]
    packed += [wha.T, bha.reshape(-1, 1)]
    wf, bf = params["feature_linear"]
    packed += [wf.T, bf.reshape(-1, 1)]
    W = wf.shape[0]
    wv, bv = params["views_linears"][0]           # input is cat([feature, input_views])
    packed += [wv[:W, :].T, wv[W:, :].T, bv.reshape(-1, 1)]
    whr, bhr = params["h_rgb_linear"]
    packed += [whr.T, bhr.reshape(-1, 1)]

    for fp in (params["flows_alpha"], params["flows_rgb"]):
        wd, bd = fp["amor_d"]
        w1, b1 = fp["amor_diag1"]
        w2, b2 = fp["amor_diag2"]
        wb, bb = fp["amor_b"]
        packed += [jnp.concatenate([wd, w1, w2, wb], axis=1).T,
                   jnp.concatenate([bd, b1, b2, bb], axis=0).reshape(-1, 1)]

    # one-hot lane-replication matrices (column ordering c = k*BN + b)
    col = jnp.arange(B)
    Rb = (col[None, :] % BN == jnp.arange(BN)[:, None]).astype(jnp.float32)   # (BN, B)
    Rk = (col[None, :] // BN == jnp.arange(K)[:, None]).astype(jnp.float32)   # (K,  B)
    packed += [Rb, Rk]

    mean_c = jnp.concatenate([params["rgb_mean"], params["alpha_mean"]]).reshape(4, 1)
    std_c = jnp.concatenate([params["rgb_std"], params["alpha_std"]]).reshape(4, 1)
    packed += [mean_c, std_c]
    return packed


# ----------------------------------------------------------------------------
# forward (training path)
# ----------------------------------------------------------------------------
def nerf_flows_forward(packed, x, eps_alpha, eps_rgb, cfg):
    # NOTE: exactly like the torch code, the SAME (K, .) noise draw is shared by all
    # BN rows; here eps is supplied deterministically by the caller.
    BN = x.shape[0]
    ic, icv = cfg["input_ch"], cfg["input_ch_views"]
    K, nf = cfg["K_samples"], cfg["n_flows"]
    B = BN * K

    pts_t = x[:, :ic].T                                   # (ic, BN)
    views_t = x[:, ic:ic + icv].T                         # (icv, BN)
    eps_t = jnp.concatenate([eps_rgb.T, eps_alpha.T], axis=0)   # (4, K) rows [rgb|alpha]

    inputs = [pts_t, views_t] + list(packed) + [eps_t]
    split_in = tuple((i - 1) in set(cfg["skips"]) for i in range(cfg["D"]))

    out = pl.pallas_call(
        functools.partial(_nerf_flows_kernel, split_in=split_in, nf=nf),
        out_shape=jax.ShapeDtypeStruct((8, B), jnp.float32),
        grid_spec=pltpu.PrefetchScalarGridSpec(
            num_scalar_prefetch=0,
            grid=(1,),                                    # tiny problem -> single step
            in_specs=[pl.BlockSpec(a.shape, lambda i: (0, 0)) for a in inputs],
            out_specs=pl.BlockSpec((8, B), lambda i: (0, 0)),
        ),
        compiler_params=pltpu.CompilerParams(dimension_semantics=("arbitrary",)),
    )(*inputs)

    z_k_rgb_alpha = out[0:4, :].reshape(4, K, BN).transpose(2, 1, 0)  # (BN, K, 4)
    loss_entropy = jnp.broadcast_to(out[4, 0], (BN, K, 1))
    return z_k_rgb_alpha, loss_entropy


# ----------------------------------------------------------------------------
# pure-JAX (XLA) reference of the torch forward pass, for correctness cross-check
# ----------------------------------------------------------------------------
def _reference_forward(params, x, eps_alpha, eps_rgb, cfg):
    with jax.default_matmul_precision("highest"):
        ic, icv = cfg["input_ch"], cfg["input_ch_views"]
        input_pts, input_views = x[:, :ic], x[:, ic:ic + icv]
        h = input_pts
        for i, (w, b) in enumerate(params["pts_linears"]):
            h = jax.nn.relu(h @ w + b)
            if i in cfg["skips"]:
                h = jnp.concatenate([input_pts, h], -1)
        wha, bha = params["h_alpha_linear"]
        h_alpha = h @ wha + bha
        wf, bf = params["feature_linear"]
        feature = h @ wf + bf
        hv = jnp.concatenate([feature, input_views], -1)
        wv, bv = params["views_linears"][0]
        hv = jax.nn.relu(hv @ wv + bv)
        whr, bhr = params["h_rgb_linear"]
        h_rgb = hv @ whr + bhr

        BN, K, nf = x.shape[0], cfg["K_samples"], cfg["n_flows"]

        def flows(z0, hcond, fp, zs):
            Bf = z0.shape[0]
            wd, bd = fp["amor_d"]; w1, b1 = fp["amor_diag1"]
            w2, b2 = fp["amor_diag2"]; wb, bb = fp["amor_b"]
            full_d = (hcond @ wd + bd).reshape(Bf, zs, zs, nf)
            diag1 = jnp.tanh(hcond @ w1 + b1).reshape(Bf, zs, nf)
            diag2 = jnp.tanh(hcond @ w2 + b2).reshape(Bf, zs, nf)
            bam = (hcond @ wb + bb).reshape(Bf, 1, zs, nf)
            triu = jnp.triu(jnp.ones((zs, zs), jnp.float32), k=1)[None, :, :, None]
            eye = jnp.eye(zs, dtype=jnp.float32)[None, :, :, None]
            r1 = full_d * triu + eye * diag1[:, :, None, :]
            r2 = jnp.transpose(full_d, (0, 2, 1, 3)) * triu + eye * diag2[:, :, None, :]
            z = z0
            ld = jnp.zeros((Bf,), jnp.float32)
            flip = jnp.arange(zs - 1, -1, -1)
            for k in range(nf):
                r1k, r2k, bk = r1[..., k], r2[..., k], bam[:, 0, :, k]
                z_per = z[:, flip] if k % 2 == 1 else z
                r2qzb = jnp.einsum('bj,bij->bi', z_per, r2k) + bk
                upd = jnp.einsum('bj,bij->bi', jnp.tanh(r2qzb), r1k)
                if k % 2 == 1:
                    upd = upd[:, flip]
                z = z + upd
                diag_j = 1.0 + (1.0 - jnp.tanh(r2qzb) ** 2) * (diag1[:, :, k] * diag2[:, :, k])
                ld = ld + jnp.log(jnp.abs(diag_j)).sum(-1)
            return z, ld

        a_mean, a_std = params["alpha_mean"], params["alpha_std"]
        r_mean, r_std = params["rgb_mean"], params["rgb_std"]
        alpha_mean_k = jnp.broadcast_to(a_mean[None, None, :], (BN, K, 1))
        alpha_std_k = jnp.broadcast_to(a_std[None, None, :], (BN, K, 1))
        alpha0 = jnp.broadcast_to(eps_alpha[None], (BN, K, 1)) * alpha_std_k + alpha_mean_k
        rgb_mean_k = jnp.broadcast_to(r_mean[None, None, :], (BN, K, 3))
        rgb_std_k = jnp.broadcast_to(r_std[None, None, :], (BN, K, 3))
        rgb0 = jnp.broadcast_to(eps_rgb[None], (BN, K, 3)) * rgb_std_k + rgb_mean_k

        ha_b = jnp.broadcast_to(h_alpha[:, None, :], (BN, K, h_alpha.shape[-1])).reshape(BN * K, -1)
        hr_b = jnp.broadcast_to(h_rgb[:, None, :], (BN, K, h_rgb.shape[-1])).reshape(BN * K, -1)

        z_a, ld_a = flows(alpha0.reshape(-1, 1), ha_b, params["flows_alpha"], 1)
        z_r, ld_r = flows(rgb0.reshape(-1, 3), hr_b, params["flows_rgb"], 3)
        z_k_alpha = z_a.reshape(BN, K, 1)
        z_k_rgb = z_r.reshape(BN, K, 3)
        sldj_a = ld_a.reshape(BN, K) + z_k_alpha.sum(-1) - jax.nn.softplus(z_k_alpha).sum(-1)
        sldj_r = ld_r.reshape(BN, K) + z_k_rgb.sum(-1) - 2 * jax.nn.softplus(z_k_rgb).sum(-1)
        base_a = -0.5 * (jnp.log(alpha_std_k) * 2 + (alpha0 - alpha_mean_k) ** 2 / alpha_std_k ** 2)
        base_r = -0.5 * (jnp.log(rgb_std_k) * 2 + (rgb0 - rgb_mean_k) ** 2 / rgb_std_k ** 2)
        loss = base_a.mean() - sldj_a.mean() + base_r.mean() - sldj_r.mean()
        return jnp.concatenate([z_k_rgb, z_k_alpha], -1), jnp.broadcast_to(loss, (BN, K, 1))


# ----------------------------------------------------------------------------
# deterministic parameter construction (mirrors the torch module's layer shapes)
# ----------------------------------------------------------------------------
def init_linear(key, in_dim, out_dim):
    k1, k2 = jax.random.split(key)
    bound = 1.0 / math.sqrt(in_dim)
    w = jax.random.uniform(k1, (in_dim, out_dim), jnp.float32, -bound, bound)
    b = jax.random.uniform(k2, (out_dim,), jnp.float32, -bound, bound)
    return w, b


def init_flow_params(key, h_dim, zs, nf):
    ks = jax.random.split(key, 4)
    return {
        "amor_d": init_linear(ks[0], h_dim, nf * zs * zs),
        "amor_diag1": init_linear(ks[1], h_dim, nf * zs),
        "amor_diag2": init_linear(ks[2], h_dim, nf * zs),
        "amor_b": init_linear(ks[3], h_dim, nf * zs),
    }


def init_params(key, cfg):
    D, W = cfg["D"], cfg["W"]
    ic, icv = cfg["input_ch"], cfg["input_ch_views"]
    keys = jax.random.split(key, 16)
    pts = [init_linear(keys[0], ic, W)]
    for i in range(D - 1):
        in_dim = W + ic if i in cfg["skips"] else W
        pts.append(init_linear(keys[1 + i], in_dim, W))
    return {
        "pts_linears": pts,
        "views_linears": [init_linear(keys[8], icv + W, W // 2)],
        "feature_linear": init_linear(keys[9], W, W),
        "h_alpha_linear": init_linear(keys[10], W, cfg["h_alpha_size"]),
        "h_rgb_linear": init_linear(keys[11], W // 2, cfg["h_rgb_size"]),
        # alpha_linear / alpha_std_linear exist in __init__ but are unused in forward.
        "alpha_mean": jnp.zeros((1,), jnp.float32),
        "alpha_std": jnp.ones((1,), jnp.float32),
        "rgb_mean": jnp.zeros((3,), jnp.float32),
        "rgb_std": jnp.ones((3,), jnp.float32),
        "flows_alpha": init_flow_params(keys[12], cfg["h_alpha_size"], 1, cfg["n_flows"]),
        "flows_rgb": init_flow_params(keys[13], cfg["h_rgb_size"], 3, cfg["n_flows"]),
    }


# ----------------------------------------------------------------------------
if __name__ == "__main__":
    cfg = dict(
        D=3,                 # netdepth
        W=32,                # netwidth
        input_ch=16,
        input_ch_views=8,
        skips=[1],
        use_viewdirs=True,
        h_alpha_size=32,
        h_rgb_size=32,
        K_samples=8,
        n_flows=2,
        z_size=3,
    )
    key = jax.random.PRNGKey(0)
    kp, kx, ka, kr = jax.random.split(key, 4)

    params = init_params(kp, cfg)

    BN = 16
    x = jax.random.normal(kx, (BN, cfg["input_ch"] + cfg["input_ch_views"]), jnp.float32)
    eps_alpha = jax.random.normal(ka, (cfg["K_samples"], 1), jnp.float32)
    eps_rgb = jax.random.normal(kr, (cfg["K_samples"], 3), jnp.float32)

    # all weight packing hoisted out of the jitted per-step forward
    packed = pack_inputs(params, cfg, BN)

    fwd = jax.jit(functools.partial(nerf_flows_forward, cfg=cfg))
    z_k_rgb_alpha, loss_entropy = fwd(packed, x, eps_alpha, eps_rgb)
    jax.block_until_ready(z_k_rgb_alpha)
    jax.block_until_ready(loss_entropy)

    assert z_k_rgb_alpha.shape == (BN, cfg["K_samples"], 4)
    assert loss_entropy.shape == (BN, cfg["K_samples"], 1)

    # cross-check the fused kernel against a pure-JAX (XLA) reference of the torch math
    z_ref, loss_ref = _reference_forward(params, x, eps_alpha, eps_rgb, cfg)
    err_z = float(jnp.max(jnp.abs(z_k_rgb_alpha - z_ref)))
    err_l = float(jnp.max(jnp.abs(loss_entropy - loss_ref)))
    assert err_z < 5e-2 and err_l < 5e-2, (err_z, err_l)

    print("KERNEL_OK")
</pallas_src>

<mosaic_0001>
module attributes {stable_mosaic.version = 11 : i64} {
  func.func @_nerf_flows_kernel(%arg0: i32, %arg1: memref<16x16xf32, #tpu.memory_space<vmem>>, %arg2: memref<8x16xf32, #tpu.memory_space<vmem>>, %arg3: memref<32x16xf32, #tpu.memory_space<vmem>>, %arg4: memref<32x1xf32, #tpu.memory_space<vmem>>, %arg5: memref<32x32xf32, #tpu.memory_space<vmem>>, %arg6: memref<32x1xf32, #tpu.memory_space<vmem>>, %arg7: memref<32x16xf32, #tpu.memory_space<vmem>>, %arg8: memref<32x32xf32, #tpu.memory_space<vmem>>, %arg9: memref<32x1xf32, #tpu.memory_space<vmem>>, %arg10: memref<32x32xf32, #tpu.memory_space<vmem>>, %arg11: memref<32x1xf32, #tpu.memory_space<vmem>>, %arg12: memref<32x32xf32, #tpu.memory_space<vmem>>, %arg13: memref<32x1xf32, #tpu.memory_space<vmem>>, %arg14: memref<16x32xf32, #tpu.memory_space<vmem>>, %arg15: memref<16x8xf32, #tpu.memory_space<vmem>>, %arg16: memref<16x1xf32, #tpu.memory_space<vmem>>, %arg17: memref<32x16xf32, #tpu.memory_space<vmem>>, %arg18: memref<32x1xf32, #tpu.memory_space<vmem>>, %arg19: memref<8x32xf32, #tpu.memory_space<vmem>>, %arg20: memref<8x1xf32, #tpu.memory_space<vmem>>, %arg21: memref<36x32xf32, #tpu.memory_space<vmem>>, %arg22: memref<36x1xf32, #tpu.memory_space<vmem>>, %arg23: memref<16x128xf32, #tpu.memory_space<vmem>>, %arg24: memref<8x128xf32, #tpu.memory_space<vmem>>, %arg25: memref<4x1xf32, #tpu.memory_space<vmem>>, %arg26: memref<4x1xf32, #tpu.memory_space<vmem>>, %arg27: memref<4x8xf32, #tpu.memory_space<vmem>>, %arg28: memref<8x128xf32, #tpu.memory_space<vmem>>) attributes {dimension_semantics = [#tpu.dimension_semantics<arbitrary>], iteration_bounds = array<i64: 1>, scalar_prefetch = 0 : i64, scratch_operands = 0 : i64, tpu.core_type = #tpu.core_type<tc>, window_params = [{pipeline_mode = #tpu.pipeline_mode<synchronous>, transform_indices = @transform_0, window_bounds = array<i64: 16, 16>}, {pipeline_mode = #tpu.pipeline_mode<synchronous>, transform_indices = @transform_1, window_bounds = array<i64: 8, 16>}, {pipeline_mode = #tpu.pipeline_mode<synchronous>, transform_indices = @transform_2, window_bounds = array<i64: 32, 16>}, {pipeline_mode = #tpu.pipeline_mode<synchronous>, transform_indices = @transform_3, window_bounds = array<i64: 32, 1>}, {pipeline_mode = #tpu.pipeline_mode<synchronous>, transform_indices = @transform_4, window_bounds = array<i64: 32, 32>}, {pipeline_mode = #tpu.pipeline_mode<synchronous>, transform_indices = @transform_5, window_bounds = array<i64: 32, 1>}, {pipeline_mode = #tpu.pipeline_mode<synchronous>, transform_indices = @transform_6, window_bounds = array<i64: 32, 16>}, {pipeline_mode = #tpu.pipeline_mode<synchronous>, transform_indices = @transform_7, window_bounds = array<i64: 32, 32>}, {pipeline_mode = #tpu.pipeline_mode<synchronous>, transform_indices = @transform_8, window_bounds = array<i64: 32, 1>}, {pipeline_mode = #tpu.pipeline_mode<synchronous>, transform_indices = @transform_9, window_bounds = array<i64: 32, 32>}, {pipeline_mode = #tpu.pipeline_mode<synchronous>, transform_indices = @transform_10, window_bounds = array<i64: 32, 1>}, {pipeline_mode = #tpu.pipeline_mode<synchronous>, transform_indices = @transform_11, window_bounds = array<i64: 32, 32>}, {pipeline_mode = #tpu.pipeline_mode<synchronous>, transform_indices = @transform_12, window_bounds = array<i64: 32, 1>}, {pipeline_mode = #tpu.pipeline_mode<synchronous>, transform_indices = @transform_13, window_bounds = array<i64: 16, 32>}, {pipeline_mode = #tpu.pipeline_mode<synchronous>, transform_indices = @transform_14, window_bounds = array<i64: 16, 8>}, {pipeline_mode = #tpu.pipeline_mode<synchronous>, transform_indices = @transform_15, window_bounds = array<i64: 16, 1>}, {pipeline_mode = #tpu.pipeline_mode<synchronous>, transform_indices = @transform_16, window_bounds = array<i64: 32, 16>}, {pipeline_mode = #tpu.pipeline_mode<synchronous>, transform_indices = @transform_17, window_bounds = array<i64: 32, 1>}, {pipeline_mode = #tpu.pipeline_mode<synchronous>, transform_indices = @transform_18, window_bounds = array<i64: 8, 32>}, {pipeline_mode = #tpu.pipeline_mode<synchronous>, transform_indices = @transform_19, window_bounds = array<i64: 8, 1>}, {pipeline_mode = #tpu.pipeline_mode<synchronous>, transform_indices = @transform_20, window_bounds = array<i64: 36, 32>}, {pipeline_mode = #tpu.pipeline_mode<synchronous>, transform_indices = @transform_21, window_bounds = array<i64: 36, 1>}, {pipeline_mode = #tpu.pipeline_mode<synchronous>, transform_indices = @transform_22, window_bounds = array<i64: 16, 128>}, {pipeline_mode = #tpu.pipeline_mode<synchronous>, transform_indices = @transform_23, window_bounds = array<i64: 8, 128>}, {pipeline_mode = #tpu.pipeline_mode<synchronous>, transform_indices = @transform_24, window_bounds = array<i64: 4, 1>}, {pipeline_mode = #tpu.pipeline_mode<synchronous>, transform_indices = @transform_25, window_bounds = array<i64: 4, 1>}, {pipeline_mode = #tpu.pipeline_mode<synchronous>, transform_indices = @transform_26, window_bounds = array<i64: 4, 8>}, {pipeline_mode = #tpu.pipeline_mode<synchronous>, transform_indices = @transform_27, window_bounds = array<i64: 8, 128>}]} {
    %c0 = arith.constant 0 : index
    %c0_0 = arith.constant 0 : index
    %0 = vector.load %arg1[%c0, %c0_0] : memref<16x16xf32, #tpu.memory_space<vmem>>, vector<16x16xf32>
    %c0_1 = arith.constant 0 : index
    %c0_2 = arith.constant 0 : index
    %1 = vector.load %arg2[%c0_1, %c0_2] : memref<8x16xf32, #tpu.memory_space<vmem>>, vector<8x16xf32>
    %c0_3 = arith.constant 0 : index
    %c0_4 = arith.constant 0 : index
    %2 = vector.load %arg3[%c0_3, %c0_4] : memref<32x16xf32, #tpu.memory_space<vmem>>, vector<32x16xf32>
    %c0_5 = arith.constant 0 : index
    %c0_6 = arith.constant 0 : index
    %3 = vector.load %arg4[%c0_5, %c0_6] : memref<32x1xf32, #tpu.memory_space<vmem>>, vector<32x1xf32>
    %cst = arith.constant dense<0.000000e+00> : vector<32x16xf32>
    %4 = tpu.matmul %2, %0, %cst {dimension_numbers = #tpu.dot_dimension_numbers<[1], [0], [0], [1], [0, 0, 1, 1], [], []>} : vector<32x16xf32>, vector<16x16xf32>, vector<32x16xf32> -> vector<32x16xf32>
    %5 = vector.broadcast %3 : vector<32x1xf32> to vector<32x16xf32>
    %6 = arith.addf %4, %5 : vector<32x16xf32>
    %cst_7 = arith.constant 0.000000e+00 : f32
    %7 = vector.broadcast %cst_7 : f32 to vector<32x16xf32>
    %8 = arith.maximumf %6, %7 : vector<32x16xf32>
    %c0_8 = arith.constant 0 : index
    %c0_9 = arith.constant 0 : index
    %9 = vector.load %arg5[%c0_8, %c0_9] : memref<32x32xf32, #tpu.memory_space<vmem>>, vector<32x32xf32>
    %c0_10 = arith.constant 0 : index
    %c0_11 = arith.constant 0 : index
    %10 = vector.load %arg6[%c0_10, %c0_11] : memref<32x1xf32, #tpu.memory_space<vmem>>, vector<32x1xf32>
    %cst_12 = arith.constant dense<0.000000e+00> : vector<32x16xf32>
    %11 = tpu.matmul %9, %8, %cst_12 {dimension_numbers = #tpu.dot_dimension_numbers<[1], [0], [0], [1], [0, 0, 1, 1], [], []>} : vector<32x32xf32>, vector<32x16xf32>, vector<32x16xf32> -> vector<32x16xf32>
    %12 = vector.broadcast %10 : vector<32x1xf32> to vector<32x16xf32>
    %13 = arith.addf %11, %12 : vector<32x16xf32>
    %cst_13 = arith.constant 0.000000e+00 : f32
    %14 = vector.broadcast %cst_13 : f32 to vector<32x16xf32>
    %15 = arith.maximumf %13, %14 : vector<32x16xf32>
    %c0_14 = arith.constant 0 : index
    %c0_15 = arith.constant 0 : index
    %16 = vector.load %arg7[%c0_14, %c0_15] : memref<32x16xf32, #tpu.memory_space<vmem>>, vector<32x16xf32>
    %c0_16 = arith.constant 0 : index
    %c0_17 = arith.constant 0 : index
    %17 = vector.load %arg8[%c0_16, %c0_17] : memref<32x32xf32, #tpu.memory_space<vmem>>, vector<32x32xf32>
    %c0_18 = arith.constant 0 : index
    %c0_19 = arith.constant 0 : index
    %18 = vector.load %arg9[%c0_18, %c0_19] : memref<32x1xf32, #tpu.memory_space<vmem>>, vector<32x1xf32>
    %cst_20 = arith.constant dense<0.000000e+00> : vector<32x16xf32>
    %19 = tpu.matmul %16, %0, %cst_20 {dimension_numbers = #tpu.dot_dimension_numbers<[1], [0], [0], [1], [0, 0, 1, 1], [], []>} : vector<32x16xf32>, vector<16x16xf32>, vector<32x16xf32> -> vector<32x16xf32>
    %cst_21 = arith.constant dense<0.000000e+00> : vector<32x16xf32>
    %20 = tpu.matmul %17, %15, %cst_21 {dimension_numbers = #tpu.dot_dimension_numbers<[1], [0], [0], [1], [0, 0, 1, 1], [], []>} : vector<32x32xf32>, vector<32x16xf32>, vector<32x16xf32> -> vector<32x16xf32>
    %21 = arith.addf %19, %20 : vector<32x16xf32>
    %22 = vector.broadcast %18 : vector<32x1xf32> to vector<32x16xf32>
    %23 = arith.addf %21, %22 : vector<32x16xf32>
    %cst_22 = arith.constant 0.000000e+00 : f32
    %24 = vector.broadcast %cst_22 : f32 to vector<32x16xf32>
    %25 = arith.maximumf %23, %24 : vector<32x16xf32>
    %c0_23 = arith.constant 0 : index
    %c0_24 = arith.constant 0 : index
    %26 = vector.load %arg10[%c0_23, %c0_24] : memref<32x32xf32, #tpu.memory_space<vmem>>, vector<32x32xf32>
    %c0_25 = arith.constant 0 : index
    %c0_26 = arith.constant 0 : index
    %27 = vector.load %arg11[%c0_25, %c0_26] : memref<32x1xf32, #tpu.memory_space<vmem>>, vector<32x1xf32>
    %c0_27 = arith.constant 0 : index
    %c0_28 = arith.constant 0 : index
    %28 = vector.load %arg12[%c0_27, %c0_28] : memref<32x32xf32, #tpu.memory_space<vmem>>, vector<32x32xf32>
    %c0_29 = arith.constant 0 : index
    %c0_30 = arith.constant 0 : index
    %29 = vector.load %arg13[%c0_29, %c0_30] : memref<32x1xf32, #tpu.memory_space<vmem>>, vector<32x1xf32>
    %c0_31 = arith.constant 0 : index
    %c0_32 = arith.constant 0 : index
    %30 = vector.load %arg14[%c0_31, %c0_32] : memref<16x32xf32, #tpu.memory_space<vmem>>, vector<16x32xf32>
    %c0_33 = arith.constant 0 : index
    %c0_34 = arith.constant 0 : index
    %31 = vector.load %arg15[%c0_33, %c0_34] : memref<16x8xf32, #tpu.memory_space<vmem>>, vector<16x8xf32>
    %c0_35 = arith.constant 0 : index
    %c0_36 = arith.constant 0 : index
    %32 = vector.load %arg16[%c0_35, %c0_36] : memref<16x1xf32, #tpu.memory_space<vmem>>, vector<16x1xf32>
    %c0_37 = arith.constant 0 : index
    %c0_38 = arith.constant 0 : index
    %33 = vector.load %arg17[%c0_37, %c0_38] : memref<32x16xf32, #tpu.memory_space<vmem>>, vector<32x16xf32>
    %c0_39 = arith.constant 0 : index
    %c0_40 = arith.constant 0 : index
    %34 = vector.load %arg18[%c0_39, %c0_40] : memref<32x1xf32, #tpu.memory_space<vmem>>, vector<32x1xf32>
    %c0_41 = arith.constant 0 : index
    %c0_42 = arith.constant 0 : index
    %35 = vector.load %arg19[%c0_41, %c0_42] : memref<8x32xf32, #tpu.memory_space<vmem>>, vector<8x32xf32>
    %c0_43 = arith.constant 0 : index
    %c0_44 = arith.constant 0 : index
    %36 = vector.load %arg20[%c0_43, %c0_44] : memref<8x1xf32, #tpu.memory_space<vmem>>, vector<8x1xf32>
    %c0_45 = arith.constant 0 : index
    %c0_46 = arith.constant 0 : index
    %37 = vector.load %arg21[%c0_45, %c0_46] : memref<36x32xf32, #tpu.memory_space<vmem>>, vector<36x32xf32>
    %c0_47 = arith.constant 0 : index
    %c0_48 = arith.constant 0 : index
    %38 = vector.load %arg22[%c0_47, %c0_48] : memref<36x1xf32, #tpu.memory_space<vmem>>, vector<36x1xf32>
    %c0_49 = arith.constant 0 : index
    %c0_50 = arith.constant 0 : index
    %39 = vector.load %arg23[%c0_49, %c0_50] : memref<16x128xf32, #tpu.memory_space<vmem>>, vector<16x128xf32>
    %c0_51 = arith.constant 0 : index
    %c0_52 = arith.constant 0 : index
    %40 = vector.load %arg24[%c0_51, %c0_52] : memref<8x128xf32, #tpu.memory_space<vmem>>, vector<8x128xf32>
    %c0_53 = arith.constant 0 : index
    %c0_54 = arith.constant 0 : index
    %41 = vector.load %arg25[%c0_53, %c0_54] : memref<4x1xf32, #tpu.memory_space<vmem>>, vector<4x1xf32>
    %c0_55 = arith.constant 0 : index
    %c0_56 = arith.constant 0 : index
    %42 = vector.load %arg26[%c0_55, %c0_56] : memref<4x1xf32, #tpu.memory_space<vmem>>, vector<4x1xf32>
    %c0_57 = arith.constant 0 : index
    %c0_58 = arith.constant 0 : index
    %43 = vector.load %arg27[%c0_57, %c0_58] : memref<4x8xf32, #tpu.memory_space<vmem>>, vector<4x8xf32>
    %cst_59 = arith.constant dense<0.000000e+00> : vector<32x16xf32>
    %44 = tpu.matmul %26, %25, %cst_59 {dimension_numbers = #tpu.dot_dimension_numbers<[1], [0], [0], [1], [0, 0, 1, 1], [], []>} : vector<32x32xf32>, vector<32x16xf32>, vector<32x16xf32> -> vector<32x16xf32>
    %45 = vector.broadcast %27 : vector<32x1xf32> to vector<32x16xf32>
    %46 = arith.addf %44, %45 : vector<32x16xf32>
    %cst_60 = arith.constant dense<0.000000e+00> : vector<32x16xf32>
    %47 = tpu.matmul %28, %25, %cst_60 {dimension_numbers = #tpu.dot_dimension_numbers<[1], [0], [0], [1], [0, 0, 1, 1], [], []>} : vector<32x32xf32>, vector<32x16xf32>, vector<32x16xf32> -> vector<32x16xf32>
    %48 = vector.broadcast %29 : vector<32x1xf32> to vector<32x16xf32>
    %49 = arith.addf %47, %48 : vector<32x16xf32>
    %cst_61 = arith.constant dense<0.000000e+00> : vector<16x16xf32>
    %50 = tpu.matmul %30, %49, %cst_61 {dimension_numbers = #tpu.dot_dimension_numbers<[1], [0], [0], [1], [0, 0, 1, 1], [], []>} : vector<16x32xf32>, vector<32x16xf32>, vector<16x16xf32> -> vector<16x16xf32>
    %cst_62 = arith.constant dense<0.000000e+00> : vector<16x16xf32>
    %51 = tpu.matmul %31, %1, %cst_62 {dimension_numbers = #tpu.dot_dimension_numbers<[1], [0], [0], [1], [0, 0, 1, 1], [], []>} : vector<16x8xf32>, vector<8x16xf32>, vector<16x16xf32> -> vector<16x16xf32>
    %52 = arith.addf %50, %51 : vector<16x16xf32>
    %53 = vector.broadcast %32 : vector<16x1xf32> to vector<16x16xf32>
    %54 = arith.addf %52, %53 : vector<16x16xf32>
    %cst_63 = arith.constant 0.000000e+00 : f32
    %55 = vector.broadcast %cst_63 : f32 to vector<16x16xf32>
    %56 = arith.maximumf %54, %55 : vector<16x16xf32>
    %cst_64 = arith.constant dense<0.000000e+00> : vector<32x16xf32>
    %57 = tpu.matmul %33, %56, %cst_64 {dimension_numbers = #tpu.dot_dimension_numbers<[1], [0], [0], [1], [0, 0, 1, 1], [], []>} : vector<32x16xf32>, vector<16x16xf32>, vector<32x16xf32> -> vector<32x16xf32>
    %58 = vector.broadcast %34 : vector<32x1xf32> to vector<32x16xf32>
    %59 = arith.addf %57, %58 : vector<32x16xf32>
    %cst_65 = arith.constant dense<0.000000e+00> : vector<8x16xf32>
    %60 = tpu.matmul %35, %46, %cst_65 {dimension_numbers = #tpu.dot_dimension_numbers<[1], [0], [0], [1], [0, 0, 1, 1], [], []>} : vector<8x32xf32>, vector<32x16xf32>, vector<8x16xf32> -> vector<8x16xf32>
    %61 = vector.broadcast %36 : vector<8x1xf32> to vector<8x16xf32>
    %62 = arith.addf %60, %61 : vector<8x16xf32>
    %cst_66 = arith.constant dense<0.000000e+00> : vector<8x128xf32>
    %63 = tpu.matmul %62, %39, %cst_66 {dimension_numbers = #tpu.dot_dimension_numbers<[1], [0], [0], [1], [0, 0, 1, 1], [], []>} : vector<8x16xf32>, vector<16x128xf32>, vector<8x128xf32> -> vector<8x128xf32>
    %cst_67 = arith.constant dense<0.000000e+00> : vector<36x16xf32>
    %64 = tpu.matmul %37, %59, %cst_67 {dimension_numbers = #tpu.dot_dimension_numbers<[1], [0], [0], [1], [0, 0, 1, 1], [], []>} : vector<36x32xf32>, vector<32x16xf32>, vector<36x16xf32> -> vector<36x16xf32>
    %65 = vector.broadcast %38 : vector<36x1xf32> to vector<36x16xf32>
    %66 = arith.addf %64, %65 : vector<36x16xf32>
    %cst_68 = arith.constant dense<0.000000e+00> : vector<36x128xf32>
    %67 = tpu.matmul %66, %39, %cst_68 {dimension_numbers = #tpu.dot_dimension_numbers<[1], [0], [0], [1], [0, 0, 1, 1], [], []>} : vector<36x16xf32>, vector<16x128xf32>, vector<36x128xf32> -> vector<36x128xf32>
    %68 = vector.broadcast %42 : vector<4x1xf32> to vector<4x8xf32>
    %69 = arith.mulf %43, %68 : vector<4x8xf32>
    %70 = vector.broadcast %41 : vector<4x1xf32> to vector<4x8xf32>
    %71 = arith.addf %69, %70 : vector<4x8xf32>
    %cst_69 = arith.constant dense<0.000000e+00> : vector<4x128xf32>
    %72 = tpu.matmul %71, %40, %cst_69 {dimension_numbers = #tpu.dot_dimension_numbers<[1], [0], [0], [1], [0, 0, 1, 1], [], []>} : vector<4x8xf32>, vector<8x128xf32>, vector<4x128xf32> -> vector<4x128xf32>
    %73 = vector.extract_strided_slice %72 {offsets = [3, 0], sizes = [1, 128], strides = [1, 1]} : vector<4x128xf32> to vector<1x128xf32>
    %74 = vector.extract_strided_slice %63 {offsets = [2, 0], sizes = [4, 128], strides = [1, 1]} : vector<8x128xf32> to vector<4x128xf32>
    %75 = math.tanh %74 : vector<4x128xf32>
    %cst_70 = arith.constant 0.000000e+00 : f32
    %76 = vector.broadcast %cst_70 : f32 to vector<1x128xf32>
    %77 = vector.extract_strided_slice %75 {offsets = [0, 0], sizes = [1, 128], strides = [1, 1]} : vector<4x128xf32> to vector<1x128xf32>
    %78 = vector.extract_strided_slice %75 {offsets = [2, 0], sizes = [1, 128], strides = [1, 1]} : vector<4x128xf32> to vector<1x128xf32>
    %79 = vector.extract_strided_slice %63 {offsets = [6, 0], sizes = [1, 128], strides = [1, 1]} : vector<8x128xf32> to vector<1x128xf32>
    %80 = arith.mulf %78, %73 : vector<1x128xf32>
    %81 = arith.addf %79, %80 : vector<1x128xf32>
    %82 = math.tanh %81 : vector<1x128xf32>
    %83 = arith.mulf %77, %82 : vector<1x128xf32>
    %84 = arith.addf %73, %83 : vector<1x128xf32>
    %85 = arith.mulf %82, %82 : vector<1x128xf32>
    %cst_71 = arith.constant 1.000000e+00 : f32
    %86 = vector.broadcast %cst_71 : f32 to vector<1x128xf32>
    %87 = arith.subf %86, %85 : vector<1x128xf32>
    %88 = arith.mulf %77, %78 : vector<1x128xf32>
    %89 = arith.mulf %87, %88 : vector<1x128xf32>
    %cst_72 = arith.constant 1.000000e+00 : f32
    %90 = vector.broadcast %cst_72 : f32 to vector<1x128xf32>
    %91 = arith.addf %90, %89 : vector<1x128xf32>
    %92 = math.absf %91 : vector<1x128xf32>
    %93 = math.log %92 : vector<1x128xf32>
    %94 = arith.addf %76, %93 : vector<1x128xf32>
    %95 = vector.extract_strided_slice %75 {offsets = [1, 0], sizes = [1, 128], strides = [1, 1]} : vector<4x128xf32> to vector<1x128xf32>
    %96 = vector.extract_strided_slice %75 {offsets = [3, 0], sizes = [1, 128], strides = [1, 1]} : vector<4x128xf32> to vector<1x128xf32>
    %97 = vector.extract_strided_slice %63 {offsets = [7, 0], sizes = [1, 128], strides = [1, 1]} : vector<8x128xf32> to vector<1x128xf32>
    %98 = arith.mulf %96, %84 : vector<1x128xf32>
    %99 = arith.addf %97, %98 : vector<1x128xf32>
    %100 = math.tanh %99 : vector<1x128xf32>
    %101 = arith.mulf %95, %100 : vector<1x128xf32>
    %102 = arith.addf %84, %101 : vector<1x128xf32>
    %103 = arith.mulf %100, %100 : vector<1x128xf32>
    %cst_73 = arith.constant 1.000000e+00 : f32
    %104 = vector.broadcast %cst_73 : f32 to vector<1x128xf32>
    %105 = arith.subf %104, %103 : vector<1x128xf32>
    %106 = arith.mulf %95, %96 : vector<1x128xf32>
    %107 = arith.mulf %105, %106 : vector<1x128xf32>
    %cst_74 = arith.constant 1.000000e+00 : f32
    %108 = vector.broadcast %cst_74 : f32 to vector<1x128xf32>
    %109 = arith.addf %108, %107 : vector<1x128xf32>
    %110 = math.absf %109 : vector<1x128xf32>
    %111 = math.log %110 : vector<1x128xf32>
    %112 = arith.addf %94, %111 : vector<1x128xf32>
    %113 = vector.extract_strided_slice %72 {offsets = [0, 0], sizes = [1, 128], strides = [1, 1]} : vector<4x128xf32> to vector<1x128xf32>
    %114 = vector.extract_strided_slice %72 {offsets = [1, 0], sizes = [1, 128], strides = [1, 1]} : vector<4x128xf32> to vector<1x128xf32>
    %115 = vector.extract_strided_slice %72 {offsets = [2, 0], sizes = [1, 128], strides = [1, 1]} : vector<4x128xf32> to vector<1x128xf32>
    %116 = vector.extract_strided_slice %67 {offsets = [18, 0], sizes = [12, 128], strides = [1, 1]} : vector<36x128xf32> to vector<12x128xf32>
    %117 = math.tanh %116 : vector<12x128xf32>
    %cst_75 = arith.constant 0.000000e+00 : f32
    %118 = vector.broadcast %cst_75 : f32 to vector<1x128xf32>
    %119 = vector.extract_strided_slice %117 {offsets = [0, 0], sizes = [1, 128], strides = [1, 1]} : vector<12x128xf32> to vector<1x128xf32>
    %120 = vector.extract_strided_slice %117 {offsets = [2, 0], sizes = [1, 128], strides = [1, 1]} : vector<12x128xf32> to vector<1x128xf32>
    %121 = vector.extract_strided_slice %117 {offsets = [4, 0], sizes = [1, 128], strides = [1, 1]} : vector<12x128xf32> to vector<1x128xf32>
    %122 = vector.extract_strided_slice %117 {offsets = [6, 0], sizes = [1, 128], strides = [1, 1]} : vector<12x128xf32> to vector<1x128xf32>
    %123 = vector.extract_strided_slice %117 {offsets = [8, 0], sizes = [1, 128], strides = [1, 1]} : vector<12x128xf32> to vector<1x128xf32>
    %124 = vector.extract_strided_slice %117 {offsets = [10, 0], sizes = [1, 128], strides = [1, 1]} : vector<12x128xf32> to vector<1x128xf32>
    %125 = vector.extract_strided_slice %67 {offsets = [2, 0], sizes = [1, 128], strides = [1, 1]} : vector<36x128xf32> to vector<1x128xf32>
    %126 = vector.extract_strided_slice %67 {offsets = [6, 0], sizes = [1, 128], strides = [1, 1]} : vector<36x128xf32> to vector<1x128xf32>
    %127 = vector.extract_strided_slice %67 {offsets = [4, 0], sizes = [1, 128], strides = [1, 1]} : vector<36x128xf32> to vector<1x128xf32>
    %128 = vector.extract_strided_slice %67 {offsets = [12, 0], sizes = [1, 128], strides = [1, 1]} : vector<36x128xf32> to vector<1x128xf32>
    %129 = vector.extract_strided_slice %67 {offsets = [10, 0], sizes = [1, 128], strides = [1, 1]} : vector<36x128xf32> to vector<1x128xf32>
    %130 = vector.extract_strided_slice %67 {offsets = [14, 0], sizes = [1, 128], strides = [1, 1]} : vector<36x128xf32> to vector<1x128xf32>
    %131 = vector.extract_strided_slice %67 {offsets = [30, 0], sizes = [1, 128], strides = [1, 1]} : vector<36x128xf32> to vector<1x128xf32>
    %132 = arith.mulf %122, %113 : vector<1x128xf32>
    %133 = arith.addf %131, %132 : vector<1x128xf32>
    %134 = arith.mulf %126, %114 : vector<1x128xf32>
    %135 = arith.addf %133, %134 : vector<1x128xf32>
    %136 = arith.mulf %128, %115 : vector<1x128xf32>
    %137 = arith.addf %135, %136 : vector<1x128xf32>
    %138 = vector.extract_strided_slice %67 {offsets = [32, 0], sizes = [1, 128], strides = [1, 1]} : vector<36x128xf32> to vector<1x128xf32>
    %139 = arith.mulf %123, %114 : vector<1x128xf32>
    %140 = arith.addf %138, %139 : vector<1x128xf32>
    %141 = arith.mulf %130, %115 : vector<1x128xf32>
    %142 = arith.addf %140, %141 : vector<1x128xf32>
    %143 = vector.extract_strided_slice %67 {offsets = [34, 0], sizes = [1, 128], strides = [1, 1]} : vector<36x128xf32> to vector<1x128xf32>
    %144 = arith.mulf %124, %115 : vector<1x128xf32>
    %145 = arith.addf %143, %144 : vector<1x128xf32>
    %146 = tpu.concatenate %137, %142, %145 in 0 : vector<1x128xf32>, vector<1x128xf32>, vector<1x128xf32> -> vector<3x128xf32>
    %147 = math.tanh %146 : vector<3x128xf32>
    %148 = vector.extract_strided_slice %147 {offsets = [0, 0], sizes = [1, 128], strides = [1, 1]} : vector<3x128xf32> to vector<1x128xf32>
    %149 = vector.extract_strided_slice %147 {offsets = [1, 0], sizes = [1, 128], strides = [1, 1]} : vector<3x128xf32> to vector<1x128xf32>
    %150 = vector.extract_strided_slice %147 {offsets = [2, 0], sizes = [1, 128], strides = [1, 1]} : vector<3x128xf32> to vector<1x128xf32>
    %151 = arith.mulf %119, %148 : vector<1x128xf32>
    %152 = arith.addf %113, %151 : vector<1x128xf32>
    %153 = arith.mulf %125, %149 : vector<1x128xf32>
    %154 = arith.addf %152, %153 : vector<1x128xf32>
    %155 = arith.mulf %127, %150 : vector<1x128xf32>
    %156 = arith.addf %154, %155 : vector<1x128xf32>
    %157 = arith.mulf %120, %149 : vector<1x128xf32>
    %158 = arith.addf %114, %157 : vector<1x128xf32>
    %159 = arith.mulf %129, %150 : vector<1x128xf32>
    %160 = arith.addf %158, %159 : vector<1x128xf32>
    %161 = arith.mulf %121, %150 : vector<1x128xf32>
    %162 = arith.addf %115, %161 : vector<1x128xf32>
    %163 = arith.mulf %148, %148 : vector<1x128xf32>
    %cst_76 = arith.constant 1.000000e+00 : f32
    %164 = vector.broadcast %cst_76 : f32 to vector<1x128xf32>
    %165 = arith.subf %164, %163 : vector<1x128xf32>
    %166 = arith.mulf %119, %122 : vector<1x128xf32>
    %167 = arith.mulf %165, %166 : vector<1x128xf32>
    %cst_77 = arith.constant 1.000000e+00 : f32
    %168 = vector.broadcast %cst_77 : f32 to vector<1x128xf32>
    %169 = arith.addf %168, %167 : vector<1x128xf32>
    %170 = arith.mulf %149, %149 : vector<1x128xf32>
    %cst_78 = arith.constant 1.000000e+00 : f32
    %171 = vector.broadcast %cst_78 : f32 to vector<1x128xf32>
    %172 = arith.subf %171, %170 : vector<1x128xf32>
    %173 = arith.mulf %120, %123 : vector<1x128xf32>
    %174 = arith.mulf %172, %173 : vector<1x128xf32>
    %cst_79 = arith.constant 1.000000e+00 : f32
    %175 = vector.broadcast %cst_79 : f32 to vector<1x128xf32>
    %176 = arith.addf %175, %174 : vector<1x128xf32>
    %177 = arith.mulf %150, %150 : vector<1x128xf32>
    %cst_80 = arith.constant 1.000000e+00 : f32
    %178 = vector.broadcast %cst_80 : f32 to vector<1x128xf32>
    %179 = arith.subf %178, %177 : vector<1x128xf32>
    %180 = arith.mulf %121, %124 : vector<1x128xf32>
    %181 = arith.mulf %179, %180 : vector<1x128xf32>
    %cst_81 = arith.constant 1.000000e+00 : f32
    %182 = vector.broadcast %cst_81 : f32 to vector<1x128xf32>
    %183 = arith.addf %182, %181 : vector<1x128xf32>
    %184 = tpu.concatenate %169, %176, %183 in 0 : vector<1x128xf32>, vector<1x128xf32>, vector<1x128xf32> -> vector<3x128xf32>
    %185 = math.absf %184 : vector<3x128xf32>
    %186 = math.log %185 : vector<3x128xf32>
    %187 = vector.extract_strided_slice %186 {offsets = [0, 0], sizes = [1, 128], strides = [1, 1]} : vector<3x128xf32> to vector<1x128xf32>
    %188 = vector.extract_strided_slice %186 {offsets = [1, 0], sizes = [1, 128], strides = [1, 1]} : vector<3x128xf32> to vector<1x128xf32>
    %189 = arith.addf %187, %188 : vector<1x128xf32>
    %190 = vector.extract_strided_slice %186 {offsets = [2, 0], sizes = [1, 128], strides = [1, 1]} : vector<3x128xf32> to vector<1x128xf32>
    %191 = arith.addf %189, %190 : vector<1x128xf32>
    %192 = arith.addf %118, %191 : vector<1x128xf32>
    %193 = vector.extract_strided_slice %117 {offsets = [1, 0], sizes = [1, 128], strides = [1, 1]} : vector<12x128xf32> to vector<1x128xf32>
    %194 = vector.extract_strided_slice %117 {offsets = [3, 0], sizes = [1, 128], strides = [1, 1]} : vector<12x128xf32> to vector<1x128xf32>
    %195 = vector.extract_strided_slice %117 {offsets = [5, 0], sizes = [1, 128], strides = [1, 1]} : vector<12x128xf32> to vector<1x128xf32>
    %196 = vector.extract_strided_slice %117 {offsets = [7, 0], sizes = [1, 128], strides = [1, 1]} : vector<12x128xf32> to vector<1x128xf32>
    %197 = vector.extract_strided_slice %117 {offsets = [9, 0], sizes = [1, 128], strides = [1, 1]} : vector<12x128xf32> to vector<1x128xf32>
    %198 = vector.extract_strided_slice %117 {offsets = [11, 0], sizes = [1, 128], strides = [1, 1]} : vector<12x128xf32> to vector<1x128xf32>
    %199 = vector.extract_strided_slice %67 {offsets = [3, 0], sizes = [1, 128], strides = [1, 1]} : vector<36x128xf32> to vector<1x128xf32>
    %200 = vector.extract_strided_slice %67 {offsets = [7, 0], sizes = [1, 128], strides = [1, 1]} : vector<36x128xf32> to vector<1x128xf32>
    %201 = vector.extract_strided_slice %67 {offsets = [5, 0], sizes = [1, 128], strides = [1, 1]} : vector<36x128xf32> to vector<1x128xf32>
    %202 = vector.extract_strided_slice %67 {offsets = [13, 0], sizes = [1, 128], strides = [1, 1]} : vector<36x128xf32> to vector<1x128xf32>
    %203 = vector.extract_strided_slice %67 {offsets = [11, 0], sizes = [1, 128], strides = [1, 1]} : vector<36x128xf32> to vector<1x128xf32>
    %204 = vector.extract_strided_slice %67 {offsets = [15, 0], sizes = [1, 128], strides = [1, 1]} : vector<36x128xf32> to vector<1x128xf32>
    %205 = vector.extract_strided_slice %67 {offsets = [31, 0], sizes = [1, 128], strides = [1, 1]} : vector<36x128xf32> to vector<1x128xf32>
    %206 = arith.mulf %196, %162 : vector<1x128xf32>
    %207 = arith.addf %205, %206 : vector<1x128xf32>
    %208 = arith.mulf %200, %160 : vector<1x128xf32>
    %209 = arith.addf %207, %208 : vector<1x128xf32>
    %210 = arith.mulf %202, %156 : vector<1x128xf32>
    %211 = arith.addf %209, %210 : vector<1x128xf32>
    %212 = vector.extract_strided_slice %67 {offsets = [33, 0], sizes = [1, 128], strides = [1, 1]} : vector<36x128xf32> to vector<1x128xf32>
    %213 = arith.mulf %197, %160 : vector<1x128xf32>
    %214 = arith.addf %212, %213 : vector<1x128xf32>
    %215 = arith.mulf %204, %156 : vector<1x128xf32>
    %216 = arith.addf %214, %215 : vector<1x128xf32>
    %217 = vector.extract_strided_slice %67 {offsets = [35, 0], sizes = [1, 128], strides = [1, 1]} : vector<36x128xf32> to vector<1x128xf32>
    %218 = arith.mulf %198, %156 : vector<1x128xf32>
    %219 = arith.addf %217, %218 : vector<1x128xf32>
    %220 = tpu.concatenate %211, %216, %219 in 0 : vector<1x128xf32>, vector<1x128xf32>, vector<1x128xf32> -> vector<3x128xf32>
    %221 = math.tanh %220 : vector<3x128xf32>
    %222 = vector.extract_strided_slice %221 {offsets = [0, 0], sizes = [1, 128], strides = [1, 1]} : vector<3x128xf32> to vector<1x128xf32>
    %223 = vector.extract_strided_slice %221 {offsets = [1, 0], sizes = [1, 128], strides = [1, 1]} : vector<3x128xf32> to vector<1x128xf32>
    %224 = vector.extract_strided_slice %221 {offsets = [2, 0], sizes = [1, 128], strides = [1, 1]} : vector<3x128xf32> to vector<1x128xf32>
    %225 = arith.mulf %195, %224 : vector<1x128xf32>
    %226 = arith.addf %156, %225 : vector<1x128xf32>
    %227 = arith.mulf %194, %223 : vector<1x128xf32>
    %228 = arith.addf %160, %227 : vector<1x128xf32>
    %229 = arith.mulf %203, %224 : vector<1x128xf32>
    %230 = arith.addf %228, %229 : vector<1x128xf32>
    %231 = arith.mulf %193, %222 : vector<1x128xf32>
    %232 = arith.addf %162, %231 : vector<1x128xf32>
    %233 = arith.mulf %199, %223 : vector<1x128xf32>
    %234 = arith.addf %232, %233 : vector<1x128xf32>
    %235 = arith.mulf %201, %224 : vector<1x128xf32>
    %236 = arith.addf %234, %235 : vector<1x128xf32>
    %237 = arith.mulf %222, %222 : vector<1x128xf32>
    %cst_82 = arith.constant 1.000000e+00 : f32
    %238 = vector.broadcast %cst_82 : f32 to vector<1x128xf32>
    %239 = arith.subf %238, %237 : vector<1x128xf32>
    %240 = arith.mulf %193, %196 : vector<1x128xf32>
    %241 = arith.mulf %239, %240 : vector<1x128xf32>
    %cst_83 = arith.constant 1.000000e+00 : f32
    %242 = vector.broadcast %cst_83 : f32 to vector<1x128xf32>
    %243 = arith.addf %242, %241 : vector<1x128xf32>
    %244 = arith.mulf %223, %223 : vector<1x128xf32>
    %cst_84 = arith.constant 1.000000e+00 : f32
    %245 = vector.broadcast %cst_84 : f32 to vector<1x128xf32>
    %246 = arith.subf %245, %244 : vector<1x128xf32>
    %247 = arith.mulf %194, %197 : vector<1x128xf32>
    %248 = arith.mulf %246, %247 : vector<1x128xf32>
    %cst_85 = arith.constant 1.000000e+00 : f32
    %249 = vector.broadcast %cst_85 : f32 to vector<1x128xf32>
    %250 = arith.addf %249, %248 : vector<1x128xf32>
    %251 = arith.mulf %224, %224 : vector<1x128xf32>
    %cst_86 = arith.constant 1.000000e+00 : f32
    %252 = vector.broadcast %cst_86 : f32 to vector<1x128xf32>
    %253 = arith.subf %252, %251 : vector<1x128xf32>
    %254 = arith.mulf %195, %198 : vector<1x128xf32>
    %255 = arith.mulf %253, %254 : vector<1x128xf32>
    %cst_87 = arith.constant 1.000000e+00 : f32
    %256 = vector.broadcast %cst_87 : f32 to vector<1x128xf32>
    %257 = arith.addf %256, %255 : vector<1x128xf32>
    %258 = tpu.concatenate %243, %250, %257 in 0 : vector<1x128xf32>, vector<1x128xf32>, vector<1x128xf32> -> vector<3x128xf32>
    %259 = math.absf %258 : vector<3x128xf32>
    %260 = math.log %259 : vector<3x128xf32>
    %261 = vector.extract_strided_slice %260 {offsets = [0, 0], sizes = [1, 128], strides = [1, 1]} : vector<3x128xf32> to vector<1x128xf32>
    %262 = vector.extract_strided_slice %260 {offsets = [1, 0], sizes = [1, 128], strides = [1, 1]} : vector<3x128xf32> to vector<1x128xf32>
    %263 = arith.addf %261, %262 : vector<1x128xf32>
    %264 = vector.extract_strided_slice %260 {offsets = [2, 0], sizes = [1, 128], strides = [1, 1]} : vector<3x128xf32> to vector<1x128xf32>
    %265 = arith.addf %263, %264 : vector<1x128xf32>
    %266 = arith.addf %192, %265 : vector<1x128xf32>
    %267 = tpu.concatenate %226, %230, %236, %102 in 0 : vector<1x128xf32>, vector<1x128xf32>, vector<1x128xf32>, vector<1x128xf32> -> vector<4x128xf32>
    %cst_88 = arith.constant 0.000000e+00 : f32
    %268 = vector.broadcast %cst_88 : f32 to vector<4x128xf32>
    %269 = arith.maximumf %267, %268 : vector<4x128xf32>
    %270 = math.absf %267 : vector<4x128xf32>
    %cst_89 = arith.constant 0.000000e+00 : f32
    %271 = vector.broadcast %cst_89 : f32 to vector<4x128xf32>
    %272 = arith.subf %271, %270 : vector<4x128xf32>
    %273 = math.exp %272 : vector<4x128xf32>
    %cst_90 = arith.constant 1.000000e+00 : f32
    %274 = vector.broadcast %cst_90 : f32 to vector<4x128xf32>
    %275 = arith.addf %274, %273 : vector<4x128xf32>
    %276 = math.log %275 : vector<4x128xf32>
    %277 = arith.addf %269, %276 : vector<4x128xf32>
    %278 = vector.extract_strided_slice %267 {offsets = [3, 0], sizes = [1, 128], strides = [1, 1]} : vector<4x128xf32> to vector<1x128xf32>
    %279 = arith.addf %112, %278 : vector<1x128xf32>
    %280 = vector.extract_strided_slice %277 {offsets = [3, 0], sizes = [1, 128], strides = [1, 1]} : vector<4x128xf32> to vector<1x128xf32>
    %281 = arith.subf %279, %280 : vector<1x128xf32>
    %282 = vector.extract_strided_slice %267 {offsets = [0, 0], sizes = [3, 128], strides = [1, 1]} : vector<4x128xf32> to vector<3x128xf32>
    %283 = vector.extract_strided_slice %282 {offsets = [0, 0], sizes = [1, 128], strides = [1, 1]} : vector<3x128xf32> to vector<1x128xf32>
    %284 = vector.extract_strided_slice %282 {offsets = [1, 0], sizes = [1, 128], strides = [1, 1]} : vector<3x128xf32> to vector<1x128xf32>
    %285 = arith.addf %283, %284 : vector<1x128xf32>
    %286 = vector.extract_strided_slice %282 {offsets = [2, 0], sizes = [1, 128], strides = [1, 1]} : vector<3x128xf32> to vector<1x128xf32>
    %287 = arith.addf %285, %286 : vector<1x128xf32>
    %288 = arith.addf %266, %287 : vector<1x128xf32>
    %289 = vector.extract_strided_slice %277 {offsets = [0, 0], sizes = [3, 128], strides = [1, 1]} : vector<4x128xf32> to vector<3x128xf32>
    %290 = vector.extract_strided_slice %289 {offsets = [0, 0], sizes = [1, 128], strides = [1, 1]} : vector<3x128xf32> to vector<1x128xf32>
    %291 = vector.extract_strided_slice %289 {offsets = [1, 0], sizes = [1, 128], strides = [1, 1]} : vector<3x128xf32> to vector<1x128xf32>
    %292 = arith.addf %290, %291 : vector<1x128xf32>
    %293 = vector.extract_strided_slice %289 {offsets = [2, 0], sizes = [1, 128], strides = [1, 1]} : vector<3x128xf32> to vector<1x128xf32>
    %294 = arith.addf %292, %293 : vector<1x128xf32>
    %cst_91 = arith.constant 2.000000e+00 : f32
    %295 = vector.broadcast %cst_91 : f32 to vector<1x128xf32>
    %296 = arith.mulf %295, %294 : vector<1x128xf32>
    %297 = arith.subf %288, %296 : vector<1x128xf32>
    %298 = math.log %42 : vector<4x1xf32>
    %cst_92 = arith.constant 2.000000e+00 : f32
    %299 = vector.broadcast %cst_92 : f32 to vector<4x1xf32>
    %300 = arith.mulf %299, %298 : vector<4x1xf32>
    %301 = vector.broadcast %41 : vector<4x1xf32> to vector<4x128xf32>
    %302 = arith.subf %72, %301 : vector<4x128xf32>
    %303 = arith.mulf %302, %302 : vector<4x128xf32>
    %304 = arith.mulf %42, %42 : vector<4x1xf32>
    %305 = vector.broadcast %304 : vector<4x1xf32> to vector<4x128xf32>
    %306 = arith.divf %303, %305 : vector<4x128xf32>
    %307 = vector.broadcast %300 : vector<4x1xf32> to vector<4x128xf32>
    %308 = arith.addf %307, %306 : vector<4x128xf32>
    %cst_93 = arith.constant -5.000000e-01 : f32
    %309 = vector.broadcast %cst_93 : f32 to vector<4x128xf32>
    %310 = arith.mulf %309, %308 : vector<4x128xf32>
    %311 = vector.extract_strided_slice %310 {offsets = [3, 0], sizes = [1, 128], strides = [1, 1]} : vector<4x128xf32> to vector<1x128xf32>
    %cst_94 = arith.constant dense<0.000000e+00> : vector<1xf32>
    %312 = vector.multi_reduction <add>, %311, %cst_94 [1] : vector<1x128xf32> to vector<1xf32>
    %313 = vector.shape_cast %312 : vector<1xf32> to vector<1x1xf32>
    %cst_95 = arith.constant 7.812500e-03 : f32
    %314 = vector.broadcast %cst_95 : f32 to vector<1x1xf32>
    %315 = arith.mulf %313, %314 : vector<1x1xf32>
    %cst_96 = arith.constant dense<0.000000e+00> : vector<1xf32>
    %316 = vector.multi_reduction <add>, %281, %cst_96 [1] : vector<1x128xf32> to vector<1xf32>
    %317 = vector.shape_cast %316 : vector<1xf32> to vector<1x1xf32>
    %cst_97 = arith.constant 7.812500e-03 : f32
    %318 = vector.broadcast %cst_97 : f32 to vector<1x1xf32>
    %319 = arith.mulf %317, %318 : vector<1x1xf32>
    %320 = arith.subf %315, %319 : vector<1x1xf32>
    %321 = vector.extract_strided_slice %310 {offsets = [0, 0], sizes = [3, 128], strides = [1, 1]} : vector<4x128xf32> to vector<3x128xf32>
    %cst_98 = arith.constant dense<0.000000e+00> : vector<3xf32>
    %322 = vector.multi_reduction <add>, %321, %cst_98 [1] : vector<3x128xf32> to vector<3xf32>
    %323 = vector.shape_cast %322 : vector<3xf32> to vector<3x1xf32>
    %324 = vector.extract_strided_slice %323 {offsets = [0, 0], sizes = [1, 1], strides = [1, 1]} : vector<3x1xf32> to vector<1x1xf32>
    %325 = vector.extract_strided_slice %323 {offsets = [1, 0], sizes = [1, 1], strides = [1, 1]} : vector<3x1xf32> to vector<1x1xf32>
    %326 = arith.addf %324, %325 : vector<1x1xf32>
    %327 = vector.extract_strided_slice %323 {offsets = [2, 0], sizes = [1, 1], strides = [1, 1]} : vector<3x1xf32> to vector<1x1xf32>
    %328 = arith.addf %326, %327 : vector<1x1xf32>
    %cst_99 = arith.constant 0.00260416674 : f32
    %329 = vector.broadcast %cst_99 : f32 to vector<1x1xf32>
    %330 = arith.mulf %328, %329 : vector<1x1xf32>
    %331 = arith.addf %320, %330 : vector<1x1xf32>
    %cst_100 = arith.constant dense<0.000000e+00> : vector<1xf32>
    %332 = vector.multi_reduction <add>, %297, %cst_100 [1] : vector<1x128xf32> to vector<1xf32>
    %333 = vector.shape_cast %332 : vector<1xf32> to vector<1x1xf32>
    %cst_101 = arith.constant 7.812500e-03 : f32
    %334 = vector.broadcast %cst_101 : f32 to vector<1x1xf32>
    %335 = arith.mulf %333, %334 : vector<1x1xf32>
    %336 = arith.subf %331, %335 : vector<1x1xf32>
    %c0_102 = arith.constant 0 : index
    %c0_103 = arith.constant 0 : index
    %337 = vector.load %arg28[%c0_102, %c0_103] : memref<8x128xf32, #tpu.memory_space<vmem>>, vector<4x128xf32>
    tpu.vector_store %arg28[%c0_102, %c0_103], %267 {strides = array<i32>} : memref<8x128xf32, #tpu.memory_space<vmem>>, vector<4x128xf32>,
    %338 = vector.shape_cast %336 : vector<1x1xf32> to vector<1x1xf32>
    %339 = vector.broadcast %338 : vector<1x1xf32> to vector<1x128xf32>
    %c4 = arith.constant 4 : index
    %c0_104 = arith.constant 0 : index
    %340 = vector.load %arg28[%c4, %c0_104] : memref<8x128xf32, #tpu.memory_space<vmem>>, vector<1x128xf32>
    tpu.vector_store %arg28[%c4, %c0_104], %339 {strides = array<i32>} : memref<8x128xf32, #tpu.memory_space<vmem>>, vector<1x128xf32>,
    %cst_105 = arith.constant 0.000000e+00 : f32
    %341 = vector.broadcast %cst_105 : f32 to vector<3x128xf32>
    %c5 = arith.constant 5 : index
    %c0_106 = arith.constant 0 : index
    %342 = vector.load %arg28[%c5, %c0_106] : memref<8x128xf32, #tpu.memory_space<vmem>>, vector<3x128xf32>
    tpu.vector_store %arg28[%c5, %c0_106], %341 {strides = array<i32>} : memref<8x128xf32, #tpu.memory_space<vmem>>, vector<3x128xf32>,
    return
  }
  func.func @transform_0(%arg0: i32) -> (i32, i32) {
    %c0_i32 = arith.constant 0 : i32
    %c0_i32_0 = arith.constant 0 : i32
    %c0_i32_1 = arith.constant 0 : i32
    return %c0_i32, %c0_i32_0 : i32, i32
  }
  func.func @transform_1(%arg0: i32) -> (i32, i32) {
    %c0_i32 = arith.constant 0 : i32
    %c0_i32_0 = arith.constant 0 : i32
    %c0_i32_1 = arith.constant 0 : i32
    return %c0_i32, %c0_i32_0 : i32, i32
  }
  func.func @transform_2(%arg0: i32) -> (i32, i32) {
    %c0_i32 = arith.constant 0 : i32
    %c0_i32_0 = arith.constant 0 : i32
    %c0_i32_1 = arith.constant 0 : i32
    return %c0_i32, %c0_i32_0 : i32, i32
  }
  func.func @transform_3(%arg0: i32) -> (i32, i32) {
    %c0_i32 = arith.constant 0 : i32
    %c0_i32_0 = arith.constant 0 : i32
    %c0_i32_1 = arith.constant 0 : i32
    return %c0_i32, %c0_i32_0 : i32, i32
  }
  func.func @transform_4(%arg0: i32) -> (i32, i32) {
    %c0_i32 = arith.constant 0 : i32
    %c0_i32_0 = arith.constant 0 : i32
    %c0_i32_1 = arith.constant 0 : i32
    return %c0_i32, %c0_i32_0 : i32, i32
  }
  func.func @transform_5(%arg0: i32) -> (i32, i32) {
    %c0_i32 = arith.constant 0 : i32
    %c0_i32_0 = arith.constant 0 : i32
    %c0_i32_1 = arith.constant 0 : i32
    return %c0_i32, %c0_i32_0 : i32, i32
  }
  func.func @transform_6(%arg0: i32) -> (i32, i32) {
    %c0_i32 = arith.constant 0 : i32
    %c0_i32_0 = arith.constant 0 : i32
    %c0_i32_1 = arith.constant 0 : i32
    return %c0_i32, %c0_i32_0 : i32, i32
  }
  func.func @transform_7(%arg0: i32) -> (i32, i32) {
    %c0_i32 = arith.constant 0 : i32
    %c0_i32_0 = arith.constant 0 : i32
    %c0_i32_1 = arith.constant 0 : i32
    return %c0_i32, %c0_i32_0 : i32, i32
  }
  func.func @transform_8(%arg0: i32) -> (i32, i32) {
    %c0_i32 = arith.constant 0 : i32
    %c0_i32_0 = arith.constant 0 : i32
    %c0_i32_1 = arith.constant 0 : i32
    return %c0_i32, %c0_i32_0 : i32, i32
  }
  func.func @transform_9(%arg0: i32) -> (i32, i32) {
    %c0_i32 = arith.constant 0 : i32
    %c0_i32_0 = arith.constant 0 : i32
    %c0_i32_1 = arith.constant 0 : i32
    return %c0_i32, %c0_i32_0 : i32, i32
  }
  func.func @transform_10(%arg0: i32) -> (i32, i32) {
    %c0_i32 = arith.constant 0 : i32
    %c0_i32_0 = arith.constant 0 : i32
    %c0_i32_1 = arith.constant 0 : i32
    return %c0_i32, %c0_i32_0 : i32, i32
  }
  func.func @transform_11(%arg0: i32) -> (i32, i32) {
    %c0_i32 = arith.constant 0 : i32
    %c0_i32_0 = arith.constant 0 : i32
    %c0_i32_1 = arith.constant 0 : i32
    return %c0_i32, %c0_i32_0 : i32, i32
  }
  func.func @transform_12(%arg0: i32) -> (i32, i32) {
    %c0_i32 = arith.constant 0 : i32
    %c0_i32_0 = arith.constant 0 : i32
    %c0_i32_1 = arith.constant 0 : i32
    return %c0_i32, %c0_i32_0 : i32, i32
  }
  func.func @transform_13(%arg0: i32) -> (i32, i32) {
    %c0_i32 = arith.constant 0 : i32
    %c0_i32_0 = arith.constant 0 : i32
    %c0_i32_1 = arith.constant 0 : i32
    return %c0_i32, %c0_i32_0 : i32, i32
  }
  func.func @transform_14(%arg0: i32) -> (i32, i32) {
    %c0_i32 = arith.constant 0 : i32
    %c0_i32_0 = arith.constant 0 : i32
    %c0_i32_1 = arith.constant 0 : i32
    return %c0_i32, %c0_i32_0 : i32, i32
  }
  func.func @transform_15(%arg0: i32) -> (i32, i32) {
    %c0_i32 = arith.constant 0 : i32
    %c0_i32_0 = arith.constant 0 : i32
    %c0_i32_1 = arith.constant 0 : i32
    return %c0_i32, %c0_i32_0 : i32, i32
  }
  func.func @transform_16(%arg0: i32) -> (i32, i32) {
    %c0_i32 = arith.constant 0 : i32
    %c0_i32_0 = arith.constant 0 : i32
    %c0_i32_1 = arith.constant 0 : i32
    return %c0_i32, %c0_i32_0 : i32, i32
  }
  func.func @transform_17(%arg0: i32) -> (i32, i32) {
    %c0_i32 = arith.constant 0 : i32
    %c0_i32_0 = arith.constant 0 : i32
    %c0_i32_1 = arith.constant 0 : i32
    return %c0_i32, %c0_i32_0 : i32, i32
  }
  func.func @transform_18(%arg0: i32) -> (i32, i32) {
    %c0_i32 = arith.constant 0 : i32
    %c0_i32_0 = arith.constant 0 : i32
    %c0_i32_1 = arith.constant 0 : i32
    return %c0_i32, %c0_i32_0 : i32, i32
  }
  func.func @transform_19(%arg0: i32) -> (i32, i32) {
    %c0_i32 = arith.constant 0 : i32
    %c0_i32_0 = arith.constant 0 : i32
    %c0_i32_1 = arith.constant 0 : i32
    return %c0_i32, %c0_i32_0 : i32, i32
  }
  func.func @transform_20(%arg0: i32) -> (i32, i32) {
    %c0_i32 = arith.constant 0 : i32
    %c0_i32_0 = arith.constant 0 : i32
    %c0_i32_1 = arith.constant 0 : i32
    return %c0_i32, %c0_i32_0 : i32, i32
  }
  func.func @transform_21(%arg0: i32) -> (i32, i32) {
    %c0_i32 = arith.constant 0 : i32
    %c0_i32_0 = arith.constant 0 : i32
    %c0_i32_1 = arith.constant 0 : i32
    return %c0_i32, %c0_i32_0 : i32, i32
  }
  func.func @transform_22(%arg0: i32) -> (i32, i32) {
    %c0_i32 = arith.constant 0 : i32
    %c0_i32_0 = arith.constant 0 : i32
    %c0_i32_1 = arith.constant 0 : i32
    return %c0_i32, %c0_i32_0 : i32, i32
  }
  func.func @transform_23(%arg0: i32) -> (i32, i32) {
    %c0_i32 = arith.constant 0 : i32
    %c0_i32_0 = arith.constant 0 : i32
    %c0_i32_1 = arith.constant 0 : i32
    return %c0_i32, %c0_i32_0 : i32, i32
  }
  func.func @transform_24(%arg0: i32) -> (i32, i32) {
    %c0_i32 = arith.constant 0 : i32
    %c0_i32_0 = arith.constant 0 : i32
    %c0_i32_1 = arith.constant 0 : i32
    return %c0_i32, %c0_i32_0 : i32, i32
  }
  func.func @transform_25(%arg0: i32) -> (i32, i32) {
    %c0_i32 = arith.constant 0 : i32
    %c0_i32_0 = arith.constant 0 : i32
    %c0_i32_1 = arith.constant 0 : i32
    return %c0_i32, %c0_i32_0 : i32, i32
  }
  func.func @transform_26(%arg0: i32) -> (i32, i32) {
    %c0_i32 = arith.constant 0 : i32
    %c0_i32_0 = arith.constant 0 : i32
    %c0_i32_1 = arith.constant 0 : i32
    return %c0_i32, %c0_i32_0 : i32, i32
  }
  func.func @transform_27(%arg0: i32) -> (i32, i32) {
    %c0_i32 = arith.constant 0 : i32
    %c0_i32_0 = arith.constant 0 : i32
    %c0_i32_1 = arith.constant 0 : i32
    return %c0_i32, %c0_i32_0 : i32, i32
  }
}

</mosaic_0001>

<bundles_post_ra>
// kernel: nerf_flows_forward.1
= control target key start
LH: loop header
LB: loop body
LE: loop exit
PB: predicated region body
PF: predicated region fallthrough
CT: control target
= control target key end

     0   :  { %vm117_vm0 = vcmask 130048   ;;  %v2355_v3 = vmov 0   ;;  %vm247_vm1 = vcmask 261120   ;;  %vm865_vm2 = vcmask 64512   ;;  %s2961_s0 = inlined_call_operand.vmem [shape: f32[16,16], index: 0, kind: input, shape index: {}]   ;;  %s2962_s2 = inlined_call_operand.vmem [shape: f32[32,16], index: 2, kind: input, shape index: {}]   ;;  %s2963_s3 = inlined_call_operand.vmem [shape: f32[32,1], index: 3, kind: input, shape index: {}]   ;;  %s2964_s5 = inlined_call_operand.vmem [shape: f32[32,1], index: 5, kind: input, shape index: {}]   ;;  %s2965_s8 = inlined_call_operand.vmem [shape: f32[32,1], index: 8, kind: input, shape index: {}]   ;;  %s2966_s12 = inlined_call_operand.vmem [shape: f32[32,1], index: 12, kind: input, shape index: {}]   ;;  %s2967_s15 = inlined_call_operand.vmem [shape: f32[16,1], index: 15, kind: input, shape index: {}]   ;;  %s2968_s10 = inlined_call_operand.vmem [shape: f32[32,1], index: 10, kind: input, shape index: {}]   ;;  %s2969_s17 = inlined_call_operand.vmem [shape: f32[32,1], index: 17, kind: input, shape index: {}]   ;;  %s2970_s19 = inlined_call_operand.vmem [shape: f32[8,1], index: 19, kind: input, shape index: {}]   ;;  %s2971_s25 = inlined_call_operand.vmem [shape: f32[4,1], index: 25, kind: input, shape index: {}]   ;;  %s2972_s21 = inlined_call_operand.vmem [shape: f32[36,1], index: 21, kind: input, shape index: {}]   ;;  %s2973_s24 = inlined_call_operand.vmem [shape: f32[4,1], index: 24, kind: input, shape index: {}]   ;;  %s2974_s4 = inlined_call_operand.vmem [shape: f32[32,32], index: 4, kind: input, shape index: {}]   ;;  %s2975_s6 = inlined_call_operand.vmem [shape: f32[32,16], index: 6, kind: input, shape index: {}]   ;;  %s2976_s7 = inlined_call_operand.vmem [shape: f32[32,32], index: 7, kind: input, shape index: {}]   ;;  %s2977_s9 = inlined_call_operand.vmem [shape: f32[32,32], index: 9, kind: input, shape index: {}]   ;;  %s2978_s11 = inlined_call_operand.vmem [shape: f32[32,32], index: 11, kind: input, shape index: {}]   ;;  %s2979_s1 = inlined_call_operand.vmem [shape: f32[8,16], index: 1, kind: input, shape index: {}]   ;;  %s2980_s14 = inlined_call_operand.vmem [shape: f32[16,8], index: 14, kind: input, shape index: {}]   ;;  %s2981_s13 = inlined_call_operand.vmem [shape: f32[16,32], index: 13, kind: input, shape index: {}]   ;;  %s2982_s16 = inlined_call_operand.vmem [shape: f32[32,16], index: 16, kind: input, shape index: {}]   ;;  %s2983_s18 = inlined_call_operand.vmem [shape: f32[8,32], index: 18, kind: input, shape index: {}]   ;;  %s2984_s22 = inlined_call_operand.vmem [shape: f32[16,128], index: 22, kind: input, shape index: {}]   ;;  %s2985_s20 = inlined_call_operand.vmem [shape: f32[36,32], index: 20, kind: input, shape index: {}]   ;;  %s2986_s23 = inlined_call_operand.vmem [shape: f32[8,128], index: 23, kind: input, shape index: {}]   ;;  %s2987_s26 = inlined_call_operand.vmem [shape: f32[4,8], index: 26, kind: input, shape index: {}]   ;;  %s2988_s27 = inlined_call_operand.vmem [shape: f32[8,128], index: 27, kind: output, shape index: {}]  }
   0x1   :  { %2999 = sst [smem:[#allocation2_spill]] %s2961_s0  ;;  %2323 = vset.pattern.permute.xlu0 %v2355_v3  ;;  %2324 = vset.pattern.permute.xlu1 %v2355_v3  ;;  %v628_v42 = vld [vmem:[%s2973_s24] sm:$0xf]  ;;  %v220_v62 = vld [vmem:[%s2974_s4 + $0x8] sm:$0xff]  ;;  %v221_v63 = vld [vmem:[%s2974_s4 + $0x10] sm:$0xff]  ;;  %vm2357_vm3 = vmmov 0  }
   0x2   :  { %3000 = sst [smem:[#allocation3_spill]] %s2962_s2  ;;  %v219_v45 = vld [vmem:[%s2974_s4] sm:$0xff]  ;;  %vm1920_vm4 = vcmask 1042432   ;;  %vm1974_vm5 = vcmask 1043459   ;;  %vm1729_vm6 = vcmask 1040384   ;;  %vm1731_vm7 = vcmask 1041408  }
   0x3   :  { %3001 = sst [smem:[#allocation4_spill]] %s2963_s3  ;;  %2171 = vmatprep.mubr.msk.f32.mxu1 %vm247_vm1, %v219_v45  ;;  %v349_v3 = vld [vmem:[%s2975_s6] sm:$0xff]  ;;  %vm1979_vm8 = vcmask 1046534  }
   0x4   :  { %3002 = sst [smem:[#allocation5_spill]] %s2964_s5 }
   0x5   :  { %3003 = sst [smem:[#allocation6_spill]] %s2965_s8 }
   0x6   :  { %3004 = sst [smem:[#allocation7_spill]] %s2966_s12 }
   0x7   :  { %3005 = sst [smem:[#allocation8_spill]] %s2967_s15 }
   0x8   :  { %3006 = sst [smem:[#allocation9_spill]] %s2968_s10 }
   0x9   :  { %3007 = sst [smem:[#allocation10_spill]] %s2969_s17 }
   0xa   :  { %3008 = sst [smem:[#allocation11_spill]] %s2970_s19 }
   0xb   :  { %3009 = sst [smem:[#allocation12_spill]] %s2971_s25 }
   0xc   :  { %3010 = sst [smem:[#allocation13_spill]] %s2972_s21 }
   0xd   :  { %s3011_s17 = sld [smem:[#allocation2_spill]] }
   0xe   :  { %s3012_s0 = sld [smem:[#allocation3_spill]] }
   0xf   :  { %s3013_s2 = sld [smem:[#allocation4_spill]] }
  0x10   :  { %s3014_s21 = sld [smem:[#allocation5_spill]] }
  0x11   :  { %s3015_s19 = sld [smem:[#allocation6_spill]] }
  0x12   :  { %s3017_s25 = sld [smem:[#allocation8_spill]] }
  0x13   :  { %v2501_v0 = vld [vmem:[%s3011_s17 + $0x8] sm:$0xff]  ;;  %v2506_v1 = vld [vmem:[%s3011_s17] sm:$0xff]  ;;  %s3018_s5 = sld [smem:[#allocation9_spill]] }
  0x14   :  { %v89_v2 = vld [vmem:[%s3012_s0] sm:$0xff]  ;;  %2153 = vmatprep.subr.mxu0 %v2501_v0  ;;  %v90_v5 = vld [vmem:[%s3012_s0 + $0x8] sm:$0xff]  ;;  %v91_v7 = vld [vmem:[%s3012_s0 + $0x10] sm:$0xff]  ;;  %s3019_s28 = sld [smem:[#allocation10_spill]] }
  0x15   :  { %2157 = vmatprep.mubr.msk.f32.mxu0 %vm117_vm0, %v89_v2  ;;  %v96_v4 = vld [vmem:[%s3013_s2 + $0x18] sm:$0xff]  ;;  %2154 = vmatpush3.msra.mxu0 %v2501_v0  ;;  %v94_v6 = vld [vmem:[%s3013_s2 + $0x8] sm:$0xff]  ;;  %v95_v8 = vld [vmem:[%s3013_s2 + $0x10] sm:$0xff]  ;;  %s3020_s15 = sld [smem:[#allocation11_spill]] }
  0x16   :  { %114 = vperm.xlu0 %2323, %v96_v4   ;;  %2155 = vmatprep.subr.mxu0 %v2506_v1  ;;  %v93_v9 = vld [vmem:[%s3013_s2] sm:$0xff]  ;;  %v92_v10 = vld [vmem:[%s3012_s0 + $0x18] sm:$0xff]  ;;  %v225_v12 = vld [vmem:[%s3014_s21 + $0x10] sm:$0xff]  ;;  %s3016_s2 = sld [smem:[#allocation7_spill]] }
  0x17   :  { %104 = vperm.xlu1 %2324, %v94_v6   ;;  %2156 = vmatpush3.msra.mxu0 %v2506_v1  ;;  %v226_v11 = vld [vmem:[%s3014_s21 + $0x18] sm:$0xff]  ;;  %v224_v13 = vld [vmem:[%s3014_s21 + $0x8] sm:$0xff]  ;;  %v223_v14 = vld [vmem:[%s3014_s21] sm:$0xff]  ;;  %s3021_s10 = sld [smem:[#allocation12_spill]] }
  0x18   :  { %2158 = vmatmul.mubr.msk.f32.vlgmr.msra.gmra.mxu0 %vm117_vm0, %v90_v5  ;;  %v360_v15 = vld [vmem:[%s3015_s19 + $0x18] sm:$0xff]  ;;  %v359_v16 = vld [vmem:[%s3015_s19 + $0x10] sm:$0xff]  ;;  %v358_v17 = vld [vmem:[%s3015_s19 + $0x8] sm:$0xff] }
  0x19   :  { %2160 = vmatprep.mubr.msk.f32.mxu0 %vm117_vm0, %v91_v7  ;;  %v357_v18 = vld [vmem:[%s3015_s19] sm:$0xff]  ;;  %v604_v23 = vld [vmem:[%s3017_s25 + $0x8] sm:$0xff]  ;;  %v590_v25 = vld [vmem:[%s3018_s5 + $0x18] sm:$0xff] }
  0x1a   :  { %109 = vperm.xlu0 %2323, %v95_v8   ;;  %v603_v24 = vld [vmem:[%s3017_s25] sm:$0xff]  ;;  %v589_v26 = vld [vmem:[%s3018_s5 + $0x10] sm:$0xff]  ;;  %v588_v27 = vld [vmem:[%s3018_s5 + $0x8] sm:$0xff]  ;;  %s3022_s25 = sld [smem:[#allocation13_spill]] }
  0x1b   :  { %99 = vperm.xlu1 %2324, %v93_v9   ;;  %v587_v28 = vld [vmem:[%s3018_s5] sm:$0xff]  ;;  %v612_v29 = vld [vmem:[%s3019_s28 + $0x18] sm:$0xff]  ;;  %v611_v32 = vld [vmem:[%s3019_s28 + $0x10] sm:$0xff] }
  0x1c   :  { %2161 = vmatmul.mubr.msk.f32.gmra.mxu0 %vm117_vm0, %v92_v10  ;;  %v598_v19 = vld [vmem:[%s3016_s2 + $0x18] sm:$0xff]  ;;  %v597_v20 = vld [vmem:[%s3016_s2 + $0x10] sm:$0xff]  ;;  %v596_v21 = vld [vmem:[%s3016_s2 + $0x8] sm:$0xff] }
  0x1d   :  { %v595_v22 = vld [vmem:[%s3016_s2] sm:$0xff]  ;;  %v610_v33 = vld [vmem:[%s3019_s28 + $0x8] sm:$0xff]  ;;  %v222_v2 = vld [vmem:[%s2974_s4 + $0x18] sm:$0xff] }
  0x1e   :  { %244 = vperm.xlu0 %2323, %v226_v11   ;;  %v614_v30 = vld [vmem:[%s3020_s15] sm:$0xff]  ;;  %v350_v4 = vld [vmem:[%s2975_s6 + $0x8] sm:$0xff]  ;;  %v352_v5 = vld [vmem:[%s2975_s6 + $0x18] sm:$0xff] }
  0x1f   :  { %239 = vperm.xlu1 %2324, %v225_v12   ;;  %v629_v31 = vld [vmem:[%s3021_s10] sm:$0xf] }
  0x20   :  { %2325 = vlog2.f32 %v629_v31  ;;  %v609_v34 = vld [vmem:[%s3019_s28] sm:$0xff]  ;;  %v621_v36 = vld [vmem:[%s3022_s25 + $0x8] sm:$0xff]  ;;  %v622_v37 = vld [vmem:[%s3022_s25 + $0x10] sm:$0xff]  ;;  %v1959_v43 = vmul.f32 %v629_v31, %v629_v31 }
  0x21   :  { %v620_v35 = vld [vmem:[%s3022_s25] sm:$0xff]  ;;  %v623_v38 = vld [vmem:[%s3022_s25 + $0x18] sm:$0xff] }
  0x22   :  { %234 = vperm.xlu0 %2323, %v224_v13   ;;  %v624_v40 = vld [vmem:[%s3022_s25 + $0x20] sm:$0xf] }
  0x23   :  { %229 = vperm.xlu1 %2324, %v223_v14  }
  0x26   :  { %572 = vperm.xlu0 %2323, %v360_v15  }
  0x27   :  { %567 = vperm.xlu1 %2324, %v359_v16  }
  0x2a   :  { %562 = vperm.xlu0 %2323, %v358_v17  }
  0x2b   :  { %557 = vperm.xlu1 %2324, %v357_v18  }
  0x2d   :  { %v2326_v39 = vpop.eup %2325 }
  0x2e   :  { %765 = vperm.xlu0 %2323, %v598_v19   ;;  %v1955_v41 = vmul.f32 0.6931472, %v2326_v39 }
  0x2f   :  { %760 = vperm.xlu1 %2324, %v597_v20  }
  0x30   :  { %v1956_v44 = vmul.f32 2.0, %v1955_v41 }
  0x32   :  { %755 = vperm.xlu0 %2323, %v596_v21  }
  0x33   :  { %750 = vperm.xlu1 %2324, %v595_v22   ;;  %v354_v22 = vld [vmem:[%s2976_s7 + $0x8] sm:$0xff] }
  0x36   :  { %1035 = vperm.xlu0 %2323, %v604_v23   ;;  %v355_v23 = vld [vmem:[%s2976_s7 + $0x10] sm:$0xff] }
  0x37   :  { %1030 = vperm.xlu1 %2324, %v603_v24   ;;  %v356_v24 = vld [vmem:[%s2976_s7 + $0x18] sm:$0xff] }
  0x3a   :  { %648 = vperm.xlu0 %2323, %v590_v25   ;;  %v583_v25 = vld [vmem:[%s2977_s9] sm:$0xff] }
  0x3b   :  { %643 = vperm.xlu1 %2324, %v589_v26   ;;  %v591_v26 = vld [vmem:[%s2978_s11] sm:$0xff] }
  0x3e   :  { %638 = vperm.xlu0 %2323, %v588_v27  }
  0x3f   :  { %633 = vperm.xlu1 %2324, %v587_v28  }
  0x42   :  { %1059 = vperm.xlu0 %2323, %v612_v29  }
  0x43   :  { %1161 = vperm.xlu1 %2324, %v614_v30  }
  0x46   :  { %1054 = vperm.xlu0 %2323, %v611_v32  }
  0x47   :  { %1049 = vperm.xlu1 %2324, %v610_v33  }
  0x4a   :  { %1044 = vperm.xlu0 %2323, %v609_v34  }
  0x4b   :  { %1312 = vperm.xlu1 %2324, %v620_v35  }
  0x4e   :  { %1317 = vperm.xlu0 %2323, %v621_v36  }
  0x4f   :  { %1322 = vperm.xlu1 %2324, %v622_v37  }
  0x52   :  { %1327 = vperm.xlu0 %2323, %v623_v38  }
  0x53   :  { %1332 = vperm.xlu1 %2324, %v624_v40  }
  0x56   :  { %1547 = vperm.xlu0 %2323, %v629_v31  }
  0x57   :  { %1553 = vperm.xlu1 %2324, %v628_v42  }
  0x5a   :  { %1962 = vperm.xlu0 %2323, %v1959_v43  }
  0x5b   :  { %1969 = vperm.xlu1 %2324, %v1956_v44  }
  0x91   :  { %v115_v46 = vpop.permute.xlu0 %114 }
  0x92   :  { %v105_v48 = vpop.permute.xlu1 %104 }
  0x95   :  { %v110_v52 = vpop.permute.xlu0 %109 }
  0x96   :  { %v100_v57 = vpop.permute.xlu1 %99 }
  0x99   :  { %v245_v6 = vpop.permute.xlu0 %244 }
  0x9a   :  { %v240_v8 = vpop.permute.xlu1 %239 }
  0x9d   :  { %v235_v12 = vpop.permute.xlu0 %234 }
  0x9e   :  { %v230_v17 = vpop.permute.xlu1 %229 }
  0xa1   :  { %v573_v30 = vpop.permute.xlu0 %572 }
  0xa2   :  { %v568_v33 = vpop.permute.xlu1 %567 }
  0xa5   :  { %v563_v42 = vpop.permute.xlu0 %562 }
  0xd8   :  { %v2159_v47 = vpop.f32.mrf.mxu0 }
  0xd9   :  { %v202_v54 = vadd.f32 %v2159_v47, %v105_v48 }
  0xda   :  { %v196_v49 = vpop.f32.mrf.mxu0 }
  0xdb   :  { %v197_v58 = vadd.f32 %v196_v49, %v100_v57  ;;  %v216_v60 = vmax.f32 %v202_v54, 0.0  ;;  %v593_v54 = vld [vmem:[%s2978_s11 + $0x10] sm:$0xff]  ;;  %v88_v57 = vld [vmem:[%s2979_s1] sm:$0xff] }
  0xdc   :  { %v2162_v50 = vpop.f32.mrf.mxu0 }
  0xdd   :  { %v212_v51 = vadd.f32 %v2162_v50, %v115_v46  ;;  %v215_v61 = vmax.f32 %v197_v58, 0.0  ;;  %v558_v46 = vpop.permute.xlu1 %557  ;;  %v601_v58 = vld [vmem:[%s2980_s14] sm:$0xff] }
  0xde   :  { %v206_v53 = vpop.f32.mrf.mxu0 }
  0xdf   :  { %v218_v55 = vmax.f32 %v212_v51, 0.0  ;;  %v207_v56 = vadd.f32 %v206_v53, %v110_v52  ;;  %v584_v51 = vld [vmem:[%s2977_s9 + $0x8] sm:$0xff]  ;;  %v585_v53 = vld [vmem:[%s2977_s9 + $0x10] sm:$0xff] }
  0xe0   :  { %v592_v52 = vld [vmem:[%s2978_s11 + $0x8] sm:$0xff] }
  0xe1   :  { %v217_v59 = vmax.f32 %v207_v56, 0.0  ;;  %2163 = vmatprep.subr.mxu1 %v218_v55  ;;  %v594_v56 = vld [vmem:[%s2978_s11 + $0x18] sm:$0xff] }
  0xe2   :  { %2164 = vmatpush3.msra.mxu1 %v218_v55  ;;  %v586_v55 = vld [vmem:[%s2977_s9 + $0x18] sm:$0xff] }
  0xe3   :  { %2165 = vmatprep.subr.mxu1 %v217_v59 }
  0xe4   :  { %2166 = vmatpush3.msra.mxu1 %v217_v59  ;;  %v602_v59 = vld [vmem:[%s2980_s14 + $0x8] sm:$0xff] }
  0xe5   :  { %2167 = vmatprep.subr.mxu1 %v216_v60 }
  0xe6   :  { %2168 = vmatpush3.msra.mxu1 %v216_v60  ;;  %v599_v60 = vld [vmem:[%s2981_s13] sm:$0xff] }
  0xe7   :  { %2169 = vmatprep.subr.mxu1 %v215_v61 }
  0xe8   :  { %2170 = vmatpush3.msra.mxu1 %v215_v61 }
  0xe9   :  { %2172 = vmatmul.mubr.msk.f32.vlgmr.msra.gmra.mxu1 %vm247_vm1, %v220_v62  ;;  %2191 = vmatprep.subr.mxu1 %v2501_v0  ;;  %v766_v62 = vpop.permute.xlu0 %765 }
  0xea   :  { %2174 = vmatprep.mubr.msk.f32.mxu1 %vm247_vm1, %v221_v63  ;;  %2192 = vmatpush3.msra.mxu1 %v2501_v0  ;;  %v353_v0 = vld [vmem:[%s2976_s7] sm:$0xff] }
  0xeb   :  { %2193 = vmatprep.subr.mxu1 %v2506_v1  ;;  %2185 = vmatprep.mubr.msk.f32.mxu0 %vm247_vm1, %v353_v0 }
  0xec   :  { %2194 = vmatpush3.msra.mxu1 %v2506_v1  ;;  %v351_v1 = vld [vmem:[%s2975_s6 + $0x10] sm:$0xff] }
  0xed   :  { %2175 = vmatmul.mubr.msk.f32.gmra.mxu1 %vm247_vm1, %v222_v2  ;;  %v761_v2 = vpop.permute.xlu1 %760 }
  0xee   :  { %2195 = vmatprep.mubr.msk.f32.mxu1 %vm117_vm0, %v349_v3 }
  0xf1   :  { %2196 = vmatmul.mubr.msk.f32.vlgmr.msra.gmra.mxu1 %vm117_vm0, %v350_v4 }
  0xf2   :  { %2198 = vmatprep.mubr.msk.f32.mxu1 %vm117_vm0, %v351_v1 }
  0xf5   :  { %2199 = vmatmul.mubr.msk.f32.gmra.mxu1 %vm117_vm0, %v352_v5  ;;  %v756_v5 = vpop.permute.xlu0 %755 }
  0xf6   :  { %2223 = vmatprep.mubr.msk.f32.mxu1 %vm247_vm1, %v591_v26 }
 0x1a9   :  { %v2173_v7 = vpop.f32.mrf.mxu1 }
 0x1aa   :  { %v332_v14 = vadd.f32 %v2173_v7, %v235_v12  ;;  %v751_v7 = vpop.permute.xlu1 %750 }
 0x1ab   :  { %v326_v9 = vpop.f32.mrf.mxu1 }
 0x1ac   :  { %v327_v18 = vadd.f32 %v326_v9, %v230_v17  ;;  %v346_v20 = vmax.f32 %v332_v14, 0.0  ;;  %v600_v9 = vld [vmem:[%s2981_s13 + $0x8] sm:$0xff] }
 0x1ad   :  { %v2176_v10 = vpop.f32.mrf.mxu1 }
 0x1ae   :  { %v342_v11 = vadd.f32 %v2176_v10, %v245_v6  ;;  %v345_v21 = vmax.f32 %v327_v18, 0.0  ;;  %v605_v10 = vld [vmem:[%s2982_s16] sm:$0xff]  ;;  %v1036_v18 = vpop.permute.xlu0 %1035 }
 0x1af   :  { %v336_v13 = vpop.f32.mrf.mxu1 }
 0x1b0   :  { %v348_v15 = vmax.f32 %v342_v11, 0.0  ;;  %v337_v16 = vadd.f32 %v336_v13, %v240_v8  ;;  %v2356_v11 = vmov 0.0  }
 0x1b1   :  { %v2197_v27 = vpop.f32.mrf.mxu1  ;;  %2018 = vst [vmem:[%s2988_s27 + $0x5] sm:$0x7] %v2356_v11 }
 0x1b2   :  { %v347_v19 = vmax.f32 %v337_v16, 0.0  ;;  %2177 = vmatprep.subr.mxu0 %v348_v15 }
 0x1b3   :  { %2178 = vmatpush3.msra.mxu0 %v348_v15  ;;  %v536_v28 = vpop.f32.mrf.mxu1 }
 0x1b4   :  { %2179 = vmatprep.subr.mxu0 %v347_v19 }
 0x1b5   :  { %2180 = vmatpush3.msra.mxu0 %v347_v19  ;;  %v2200_v32 = vpop.f32.mrf.mxu1 }
 0x1b6   :  { %2181 = vmatprep.subr.mxu0 %v346_v20 }
 0x1b7   :  { %2182 = vmatpush3.msra.mxu0 %v346_v20  ;;  %v546_v37 = vpop.f32.mrf.mxu1 }
 0x1b8   :  { %2183 = vmatprep.subr.mxu0 %v345_v21 }
 0x1b9   :  { %2184 = vmatpush3.msra.mxu0 %v345_v21 }
 0x1ba   :  { %2186 = vmatmul.mubr.msk.f32.vlgmr.msra.gmra.mxu0 %vm247_vm1, %v354_v22  ;;  %v1031_v22 = vpop.permute.xlu1 %1030 }
 0x1bb   :  { %2188 = vmatprep.mubr.msk.f32.mxu0 %vm247_vm1, %v355_v23 }
 0x1be   :  { %2189 = vmatmul.mubr.msk.f32.gmra.mxu0 %vm247_vm1, %v356_v24 }
 0x1bf   :  { %2209 = vmatprep.mubr.msk.f32.mxu0 %vm247_vm1, %v583_v25 }
 0x27a   :  { %v2187_v29 = vpop.f32.mrf.mxu0 }
 0x27b   :  { %v542_v35 = vadd.f32 %v2197_v27, %v2187_v29  ;;  %v649_v27 = vpop.permute.xlu0 %648  ;;  %v606_v29 = vld [vmem:[%s2982_s16 + $0x8] sm:$0xff] }
 0x27c   :  { %v439_v31 = vpop.f32.mrf.mxu0 }
 0x27d   :  { %v537_v39 = vadd.f32 %v536_v28, %v439_v31  ;;  %v576_v43 = vadd.f32 %v563_v42, %v542_v35  ;;  %v607_v31 = vld [vmem:[%s2982_s16 + $0x10] sm:$0xff] }
 0x27e   :  { %v2190_v34 = vpop.f32.mrf.mxu0 }
 0x27f   :  { %v552_v36 = vadd.f32 %v2200_v32, %v2190_v34  ;;  %v575_v47 = vadd.f32 %v558_v46, %v537_v39  ;;  %v580_v49 = vmax.f32 %v576_v43, 0.0  ;;  %v608_v34 = vld [vmem:[%s2982_s16 + $0x18] sm:$0xff]  ;;  %v639_v35 = vpop.permute.xlu0 %638  ;;  %v613_v39 = vld [vmem:[%s2983_s18] sm:$0xff] }
 0x280   :  { %v449_v38 = vpop.f32.mrf.mxu0 }
 0x281   :  { %v578_v40 = vadd.f32 %v573_v30, %v552_v36  ;;  %v547_v41 = vadd.f32 %v546_v37, %v449_v38  ;;  %v579_v50 = vmax.f32 %v575_v47, 0.0  ;;  %v644_v30 = vpop.permute.xlu1 %643 }
 0x283   :  { %v582_v44 = vmax.f32 %v578_v40, 0.0  ;;  %v577_v45 = vadd.f32 %v568_v33, %v547_v41  ;;  %v626_v40 = vld [vmem:[%s2984_s22 + $0x8] sm:$0xff]  ;;  %v625_v41 = vld [vmem:[%s2984_s22] sm:$0xff] }
 0x285   :  { %v581_v48 = vmax.f32 %v577_v45, 0.0  ;;  %2201 = vmatprep.subr.mxu0 %v582_v44  ;;  %2215 = vmatprep.subr.mxu1 %v582_v44  ;;  %v634_v37 = vpop.permute.xlu1 %633 }
 0x286   :  { %2202 = vmatpush3.msra.mxu0 %v582_v44  ;;  %2216 = vmatpush3.msra.mxu1 %v582_v44  ;;  %v1060_v44 = vpop.permute.xlu0 %1059 }
 0x287   :  { %2203 = vmatprep.subr.mxu0 %v581_v48  ;;  %2217 = vmatprep.subr.mxu1 %v581_v48 }
 0x288   :  { %2204 = vmatpush3.msra.mxu0 %v581_v48  ;;  %2218 = vmatpush3.msra.mxu1 %v581_v48 }
 0x289   :  { %2205 = vmatprep.subr.mxu0 %v580_v49  ;;  %2219 = vmatprep.subr.mxu1 %v580_v49  ;;  %v1162_v47 = vpop.permute.xlu1 %1161 }
 0x28a   :  { %2206 = vmatpush3.msra.mxu0 %v580_v49  ;;  %2220 = vmatpush3.msra.mxu1 %v580_v49  ;;  %v1055_v49 = vpop.permute.xlu0 %1054 }
 0x28b   :  { %2207 = vmatprep.subr.mxu0 %v579_v50  ;;  %2221 = vmatprep.subr.mxu1 %v579_v50 }
 0x28c   :  { %2208 = vmatpush3.msra.mxu0 %v579_v50  ;;  %2222 = vmatpush3.msra.mxu1 %v579_v50 }
 0x28d   :  { %2210 = vmatmul.mubr.msk.f32.vlgmr.msra.gmra.mxu0 %vm247_vm1, %v584_v51  ;;  %2224 = vmatmul.mubr.msk.f32.vlgmr.msra.gmra.mxu1 %vm247_vm1, %v592_v52 }
 0x28e   :  { %2212 = vmatprep.mubr.msk.f32.mxu0 %vm247_vm1, %v585_v53  ;;  %2226 = vmatprep.mubr.msk.f32.mxu1 %vm247_vm1, %v593_v54  ;;  %v1050_v54 = vpop.permute.xlu1 %1049 }
 0x28f   :  { %2229 = vmatprep.subr.mxu0 %v88_v57 }
 0x290   :  { %2230 = vmatpush3.msra.mxu0 %v88_v57 }
 0x291   :  { %2213 = vmatmul.mubr.msk.f32.gmra.mxu0 %vm247_vm1, %v586_v55  ;;  %2227 = vmatmul.mubr.msk.f32.gmra.mxu1 %vm247_vm1, %v594_v56  ;;  %v1045_v56 = vpop.permute.xlu0 %1044 }
 0x292   :  { %2231 = vmatprep.mubr.msk.f32.mxu0 %vm865_vm2, %v601_v58  ;;  %2242 = vmatprep.mubr.msk.f32.mxu1 %vm247_vm1, %v599_v60  ;;  %v615_v58 = vld [vmem:[%s2985_s20] sm:$0xff]  ;;  %v617_v60 = vld [vmem:[%s2985_s20 + $0x10] sm:$0xff] }
 0x295   :  { %2232 = vmatmul.mubr.msk.f32.vlgmr.msra.gmra.mxu0 %vm865_vm2, %v602_v59  ;;  %v616_v59 = vld [vmem:[%s2985_s20 + $0x8] sm:$0xff] }
 0x296   :  { %2249 = vmatprep.mubr.msk.f32.mxu0 %vm117_vm0, %v605_v10 }
 0x34d   :  { %v2225_v61 = vpop.f32.mrf.mxu1  ;;  %v2211_v12 = vpop.f32.mrf.mxu0 }
 0x34e   :  { %v852_v6 = vadd.f32 %v2225_v61, %v756_v5  ;;  %v735_v36 = vadd.f32 %v2211_v12, %v639_v35  ;;  %v618_v61 = vld [vmem:[%s2985_s20 + $0x18] sm:$0xff] }
 0x34f   :  { %v846_v63 = vpop.f32.mrf.mxu1  ;;  %v729_v13 = vpop.f32.mrf.mxu0 }
 0x350   :  { %v847_v8 = vadd.f32 %v846_v63, %v751_v7  ;;  %v730_v38 = vadd.f32 %v729_v13, %v634_v37 }
 0x351   :  { %v2228_v3 = vpop.f32.mrf.mxu1  ;;  %v2214_v14 = vpop.f32.mrf.mxu0 }
 0x352   :  { %v862_v4 = vadd.f32 %v2228_v3, %v766_v62  ;;  %v745_v32 = vadd.f32 %v2214_v14, %v649_v27  ;;  %v619_v62 = vld [vmem:[%s2985_s20 + $0x20] sm:$0xf]  ;;  %v1313_v3 = vpop.permute.xlu1 %1312 }
 0x353   :  { %v856_v0 = vpop.f32.mrf.mxu1  ;;  %v739_v15 = vpop.f32.mrf.mxu0 }
 0x354   :  { %v857_v1 = vadd.f32 %v856_v0, %v761_v2  ;;  %2234 = vmatprep.subr.mxu1 %v862_v4  ;;  %v740_v33 = vadd.f32 %v739_v15, %v644_v30 }
 0x355   :  { %2235 = vmatpush3.msra.mxu1 %v862_v4  ;;  %v2233_v16 = vpop.f32.mrf.mxu0 }
 0x356   :  { %2236 = vmatprep.subr.mxu1 %v857_v1  ;;  %v1323_v10 = vpop.permute.xlu1 %1322 }
 0x357   :  { %2237 = vmatpush3.msra.mxu1 %v857_v1  ;;  %v938_v20 = vpop.f32.mrf.mxu0  ;;  %v627_v1 = vld [vmem:[%s2986_s23] sm:$0xff] }
 0x358   :  { %2238 = vmatprep.subr.mxu1 %v852_v6 }
 0x359   :  { %2239 = vmatpush3.msra.mxu1 %v852_v6  ;;  %v1318_v6 = vpop.permute.xlu0 %1317 }
 0x35a   :  { %2240 = vmatprep.subr.mxu1 %v847_v8 }
 0x35b   :  { %2241 = vmatpush3.msra.mxu1 %v847_v8 }
 0x35c   :  { %2243 = vmatmul.mubr.msk.f32.vlgmr.msra.gmra.mxu1 %vm247_vm1, %v600_v9  ;;  %2266 = vmatprep.subr.mxu1 %v2356_v11 }
 0x35d   :  { %2270 = vmatprep.mubr.msk.f32.mxu1 %vm2357_vm3, %v2356_v11  ;;  %2267 = vmatpush3.msra.mxu1 %v626_v40  ;;  %v1328_v14 = vpop.permute.xlu0 %1327 }
 0x35e   :  { %2268 = vmatprep.subr.mxu1 %v2356_v11 }
 0x35f   :  { %2269 = vmatpush3.msra.mxu1 %v625_v41 }
 0x360   :  { %2273 = vmatprep.subr.mxu1 %v2356_v11 }
 0x41c   :  { %v2244_v17 = vpop.f32.mrf.mxu1 }
 0x41d   :  { %v1025_v19 = vadd.f32 %v2244_v17, %v2233_v16 }
 0x41e   :  { %v1019_v21 = vpop.f32.mrf.mxu1 }
 0x41f   :  { %v1039_v23 = vadd.f32 %v1036_v18, %v1025_v19  ;;  %v1020_v24 = vadd.f32 %v1019_v21, %v938_v20  ;;  %v630_v18 = vld [vmem:[%s2987_s26] sm:$0xf]  ;;  %v1333_v19 = vpop.permute.xlu1 %1332  ;;  %v1548_v21 = vpop.permute.xlu0 %1547 }
 0x421   :  { %v1041_v25 = vmax.f32 %v1039_v23, 0.0  ;;  %v1038_v26 = vadd.f32 %v1031_v22, %v1020_v24  ;;  %v1550_v23 = vmul.f32 %v1548_v21, %v630_v18 }
 0x423   :  { %v1040_v28 = vmax.f32 %v1038_v26, 0.0  ;;  %2245 = vmatprep.subr.mxu0 %v1041_v25  ;;  %v1554_v26 = vpop.permute.xlu1 %1553 }
 0x424   :  { %2246 = vmatpush3.msra.mxu0 %v1041_v25  ;;  %v1556_v27 = vadd.f32 %v1554_v26, %v1550_v23 }
 0x425   :  { %2247 = vmatprep.subr.mxu0 %v1040_v28 }
 0x426   :  { %2248 = vmatpush3.msra.mxu0 %v1040_v28 }
 0x427   :  { %2250 = vmatmul.mubr.msk.f32.vlgmr.msra.gmra.mxu0 %vm117_vm0, %v606_v29  ;;  %2255 = vmatprep.subr.mxu0 %v2356_v11 }
 0x428   :  { %2256 = vmatpush3.msra.mxu0 %v745_v32  ;;  %2252 = vmatprep.mubr.msk.f32.mxu0 %vm117_vm0, %v607_v31  ;;  %v1963_v32 = vpop.permute.xlu0 %1962 }
 0x429   :  { %2257 = vmatprep.subr.mxu0 %v2356_v11 }
 0x42a   :  { %2258 = vmatpush3.msra.mxu0 %v740_v33 }
 0x42b   :  { %2253 = vmatmul.mubr.msk.f32.gmra.mxu0 %vm117_vm0, %v608_v34  ;;  %2259 = vmatprep.subr.mxu0 %v2356_v11 }
 0x42c   :  { %2260 = vmatpush3.msra.mxu0 %v735_v36  ;;  %2263 = vmatprep.mubr.msk.f32.mxu0 %vm2357_vm3, %v2356_v11 }
 0x42d   :  { %2261 = vmatprep.subr.mxu0 %v2356_v11 }
 0x42e   :  { %2262 = vmatpush3.msra.mxu0 %v730_v38 }
 0x42f   :  { %2264 = vmatmul.mubr.msk.f32.vlgmr.msra.gmra.mxu0 %vm247_vm1, %v613_v39  ;;  %2296 = vmatprep.subr.mxu0 %v2356_v11 }
 0x430   :  { %2300 = vmatprep.mubr.msk.f32.mxu0 %vm2357_vm3, %v2356_v11  ;;  %2297 = vmatpush3.msra.mxu0 %v626_v40 }
 0x431   :  { %2298 = vmatprep.subr.mxu0 %v2356_v11 }
 0x432   :  { %2299 = vmatpush3.msra.mxu0 %v625_v41 }
 0x433   :  { %2315 = vmatprep.subr.mxu0 %v2356_v11 }
 0x4e7   :  { %v2251_v42 = vpop.f32.mrf.mxu0 }
 0x4e8   :  { %v1146_v55 = vadd.f32 %v2251_v42, %v1050_v54 }
 0x4e9   :  { %v1140_v43 = vpop.f32.mrf.mxu0 }
 0x4ea   :  { %v1141_v57 = vadd.f32 %v1140_v43, %v1045_v56 }
 0x4eb   :  { %v2254_v45 = vpop.f32.mrf.mxu0 }
 0x4ec   :  { %v1156_v51 = vadd.f32 %v2254_v45, %v1060_v44 }
 0x4ed   :  { %v1150_v46 = vpop.f32.mrf.mxu0 }
 0x4ee   :  { %v1151_v53 = vadd.f32 %v1150_v46, %v1055_v49 }
 0x4ef   :  { %v1233_v48 = vpop.f32.mrf.mxu0 }
 0x4f0   :  { %v1234_v50 = vadd.f32 %v1233_v48, %v1162_v47 }
 0x4f1   :  { %v2265_v52 = vpop.f32.mrf.mxu0 }
 0x4f2   :  { %2271 = vmatmul.mubr.msk.f32.vlgmr.msra.gmra.mxu1 %vm117_vm0, %v1234_v50  ;;  %v1970_v50 = vpop.permute.xlu1 %1969 }
 0x4f3   :  { %2274 = vmatpush3.msra.mxu1 %v1156_v51  ;;  %2281 = vmatprep.mubr.msk.f32.mxu1 %vm2357_vm3, %v2356_v11 }
 0x4f4   :  { %2275 = vmatprep.subr.mxu1 %v2356_v11 }
 0x4f5   :  { %2276 = vmatpush3.msra.mxu1 %v1151_v53 }
 0x4f6   :  { %2277 = vmatprep.subr.mxu1 %v2356_v11 }
 0x4f7   :  { %2278 = vmatpush3.msra.mxu1 %v1146_v55 }
 0x4f8   :  { %2279 = vmatprep.subr.mxu1 %v2356_v11 }
 0x4f9   :  { %2280 = vmatpush3.msra.mxu1 %v1141_v57 }
 0x4fa   :  { %2282 = vmatmul.mubr.msk.f32.vlgmr.msra.gmra.mxu1 %vm247_vm1, %v615_v58 }
 0x4fb   :  { %2284 = vmatprep.mubr.msk.f32.mxu1 %vm2357_vm3, %v2356_v11 }
 0x4fe   :  { %2285 = vmatmul.mubr.msk.f32.gmra.mxu1 %vm247_vm1, %v616_v59 }
 0x4ff   :  { %2287 = vmatprep.mubr.msk.f32.mxu1 %vm2357_vm3, %v2356_v11 }
 0x502   :  { %2288 = vmatmul.mubr.msk.f32.gmra.mxu1 %vm247_vm1, %v617_v60 }
 0x503   :  { %2290 = vmatprep.mubr.msk.f32.mxu1 %vm2357_vm3, %v2356_v11 }
 0x506   :  { %2291 = vmatmul.mubr.msk.f32.gmra.mxu1 %vm247_vm1, %v618_v61 }
 0x507   :  { %2293 = vmatprep.mubr.msk.f32.mxu1 %vm2357_vm3, %v2356_v11 }
 0x50a   :  { %2294 = vmatmul.mubr.msk.f32.gmra.mxu1 %vm247_vm1, %v619_v62 }
 0x5b2   :  { %v2809_v63 = vpop.f32.mrf.mxu1 }
 0x5b3   :  { %2327 = vtanh.f32 %v2809_v63 }
 0x5b4   :  { %v2272_v2 = vpop.f32.mrf.mxu1  ;;  %2329 = vrcp.f32 %v1963_v32 }
 0x5ba   :  { %v1416_v4 = vpop.f32.mrf.mxu1 }
 0x5bb   :  { %v1417_v0 = vadd.f32 %v1416_v4, %v1313_v3 }
 0x5bc   :  { %v2283_v5 = vpop.f32.mrf.mxu1 }
 0x5bd   :  { %2301 = vmatmul.mubr.msk.f32.vlgmr.msra.gmra.mxu0 %vm117_vm0, %v1417_v0 }
 0x5be   :  { %v1421_v7 = vpop.f32.mrf.mxu1  ;;  %2303 = vmatprep.mubr.msk.f32.mxu0 %vm2357_vm3, %v2356_v11  ;;  %2316 = vmatpush3.msra.mxu0 %v627_v1 }
 0x5bf   :  { %v1422_v8 = vadd.f32 %v1421_v7, %v1318_v6 }
 0x5c0   :  { %v2286_v9 = vpop.f32.mrf.mxu1  ;;  %v2851_v41 = vpop.eup %2327 }
 0x5c1   :  { %2304 = vmatmul.mubr.msk.f32.gmra.mxu0 %vm117_vm0, %v1422_v8  ;;  %v2330_v46 = vpop.eup %2329 }
 0x5c2   :  { %v1426_v12 = vpop.f32.mrf.mxu1  ;;  %2306 = vmatprep.mubr.msk.f32.mxu0 %vm2357_vm3, %v2356_v11 }
 0x5c3   :  { %v1427_v13 = vadd.f32 %v1426_v12, %v1323_v10 }
 0x5c4   :  { %v2289_v15 = vpop.f32.mrf.mxu1 }
 0x5c5   :  { %2307 = vmatmul.mubr.msk.f32.gmra.mxu0 %vm117_vm0, %v1427_v13 }
 0x5c6   :  { %v1431_v16 = vpop.f32.mrf.mxu1  ;;  %2309 = vmatprep.mubr.msk.f32.mxu0 %vm2357_vm3, %v2356_v11 }
 0x5c7   :  { %v1432_v17 = vadd.f32 %v1431_v16, %v1328_v14 }
 0x5c8   :  { %v2292_v20 = vpop.f32.mrf.mxu1 }
 0x5c9   :  { %2310 = vmatmul.mubr.msk.f32.gmra.mxu0 %vm117_vm0, %v1432_v17 }
 0x5ca   :  { %v1436_v22 = vpop.f32.mrf.mxu1  ;;  %2312 = vmatprep.mubr.msk.f32.mxu0 %vm2357_vm3, %v2356_v11 }
 0x5cb   :  { %v1437_v24 = vadd.f32 %v1436_v22, %v1333_v19 }
 0x5cc   :  { %v2295_v25 = vpop.f32.mrf.mxu1 }
 0x5cd   :  { %2313 = vmatmul.mubr.msk.f32.gmra.mxu0 %vm117_vm0, %v1437_v24 }
 0x5ce   :  { %2317 = vmatprep.mubr.msk.f32.mxu0 %vm2357_vm3, %v2356_v11 }
 0x5d1   :  { %2318 = vmatmul.mubr.msk.f32.vlgmr.msra.gmra.mxu0 %vm865_vm2, %v1556_v27 }
 0x67d   :  { %v2837_v28 = vpop.f32.mrf.mxu0 }
 0x67f   :  { %v2302_v29 = vpop.f32.mrf.mxu0 }
 0x681   :  { %v2839_v30 = vpop.f32.mrf.mxu0 }
 0x683   :  { %v2305_v31 = vpop.f32.mrf.mxu0 }
 0x685   :  { %v1531_v33 = vpop.f32.mrf.mxu0 }
 0x687   :  { %v2308_v34 = vpop.f32.mrf.mxu0 }
 0x689   :  { %v2842_v35 = vpop.f32.mrf.mxu0 }
 0x68a   :  { %2331 = vtanh.f32 %v2842_v35 }
 0x68b   :  { %v2311_v36 = vpop.f32.mrf.mxu0  ;;  %2333 = vtanh.f32 %v1531_v33 }
 0x68d   :  { %v2845_v37 = vpop.f32.mrf.mxu0 }
 0x68f   :  { %v2314_v11 = vpop.f32.mrf.mxu0 }
 0x691   :  { %v2847_v38 = vpop.f32.mrf.mxu0 }
 0x692   :  { %v1632_v39 = vrot.slane %v2847_v38, 7  ;;  %v1957_v40 = vsub.f32 %v2847_v38, %v1554_v26  ;;  %v1711_v43 = vrot.slane %v2847_v38, 4  ;;  %v1695_v51 = vrot.slane %v2847_v38, 3 }
 0x693   :  { %v2319_v42 = vpop.f32.mrf.mxu0  ;;  %v1699_v52 = vrot.slane %v2847_v38, 6 }
 0x694   :  { %v1958_v44 = vmul.f32 %v1957_v40, %v1957_v40  ;;  %v1634_v45 = vmul.f32 %v2851_v41, %v1632_v39  ;;  %v1713_v56 = vmul.f32 %v1711_v43, %v2839_v30  ;;  %v1697_v4 = vmul.f32 %v1695_v51, %v2837_v28 }
 0x695   :  { %v1701_v2 = vmul.f32 %v1699_v52, %v2839_v30 }
 0x696   :  { %v1966_v47 = vmul.f32 %v2330_v46, %v1958_v44  ;;  %v1636_v48 = vrot.slane %v1634_v45, 6  ;;  %v1715_v0 = vrot.slane %v1713_v56, 6 }
 0x697   :  { %v2855_v49 = vpop.eup %2331  ;;  %v1703_v9 = vrot.slane %v1701_v2, 6 }
 0x698   :  { %v1690_v53 = vmul.f32 %v2855_v49, %v2847_v38  ;;  %v1776_v54 = vrot.slane %v2855_v49, 6  ;;  %v1972_v55 = vadd.f32 %v1970_v50, %v1966_v47  ;;  %v2863_v57 = vpop.eup %2333  ;;  %v1638_v58 = vadd.f32 %v1636_v48, %v2809_v63 }
 0x699   :  { %v1706_v59 = vmul.f32 %v2855_v49, %v1632_v39  ;;  %v1718_v1 = vmul.f32 %v2855_v49, %v1699_v52 }
 0x69a   :  { %v1692_v60 = vrot.slane %v1690_v53, 2  ;;  %v2868_v61 = vmul.f32 %v2863_v57, %v1776_v54  ;;  %v1973_v62 = vmul.f32 -0.5, %v1972_v55  ;;  %2335 = vtanh.f32 %v1638_v58 }
 0x69b   :  { %v1708_v3 = vrot.slane %v1706_v59, 2  ;;  %v1720_v12 = vrot.slane %v1718_v1, 2 }
 0x69c   :  { %v1988_v5 = vsel %vm1920_vm4, %v1973_v62, 0.0  ;;  %v1694_v6 = vadd.f32 %v1692_v60, %v2842_v35  ;;  %v1975_v14 = vsel %vm1974_vm5, %v1973_v62, 0.0  ;;  %v1780_v29 = vrot.slane %v2868_v61, 2 }
 0x69d   :  { %v1710_v7 = vadd.f32 %v1708_v3, %v2845_v37  ;;  %1989 = vadd.xlane.f32.xlu0 %v1988_v5  ;;  %v1722_v17 = vadd.f32 %v1720_v12, %v2845_v37  ;;  %v1784_v39 = vrot.slane %v2868_v61, 3  ;;  %v1788_v40 = vrot.slane %v2868_v61, 4 }
 0x69e   :  { %v1698_v8 = vadd.f32 %v1697_v4, %v1694_v6 }
 0x69f   :  { %v1717_v10 = vadd.f32 %v1715_v0, %v1710_v7 }
 0x6a0   :  { %v1705_v13 = vadd.f32 %v1703_v9, %v1698_v8 }
 0x6a1   :  { %1976 = vadd.xlane.f32.xlu0 %v1975_v14  ;;  %v1727_v16 = vrot.slane %v1717_v10, 7 }
 0x6a2   :  { %v1724_v15 = vrot.slane %v1705_v13, 6 }
 0x6a4   :  { %v1730_v18 = vsel %vm1729_vm6, %v1724_v15, %v1727_v16 }
 0x6a5   :  { %v1732_v19 = vsel %vm1731_vm7, %v1730_v18, %v1722_v17 }
 0x6a6   :  { %2337 = vtanh.f32 %v1732_v19 }
 0x6a7   :  { %v2879_v20 = vpop.eup %2335 }
 0x6a8   :  { %v1641_v21 = vrot.slane %v2879_v20, 4 }
 0x6aa   :  { %v1643_v22 = vmul.f32 %v2851_v41, %v1641_v21 }
 0x6ac   :  { %v1645_v24 = vrot.slane %v1643_v22, 7 }
 0x6ae   :  { %v2892_v44 = vadd.f32 %v1645_v24, %v2847_v38 }
 0x6b0   :  { %v1664_v0 = vrot.slane %v2892_v44, 6 }
 0x6b2   :  { %v1666_v14 = vmul.f32 %v2851_v41, %v1664_v0 }
 0x6b3   :  { %v2338_v23 = vpop.eup %2337 }
 0x6b4   :  { %v1735_v25 = vrot.slane %v2338_v23, 6  ;;  %v1742_v26 = vrot.slane %v2338_v23, 7  ;;  %v1754_v27 = vrot.slane %v2338_v23, 5  ;;  %v1766_v31 = vrot.slane %v2338_v23, 4 }
 0x6b5   :  { %v1773_v32 = vmul.f32 %v2338_v23, %v2338_v23  ;;  %v1761_v11 = vmul.f32 %v2338_v23, %v2839_v30 }
 0x6b6   :  { %v1737_v33 = vmul.f32 %v2863_v57, %v1735_v25  ;;  %v1744_v34 = vmul.f32 %v1742_v26, %v2837_v28  ;;  %v1756_v36 = vmul.f32 %v2863_v57, %v1754_v27  ;;  %v1768_v42 = vmul.f32 %v2863_v57, %v1766_v31 }
 0x6b7   :  { %v1774_v43 = vsub.f32 1.0, %v1773_v32  ;;  %v1749_v46 = vmul.f32 %v1735_v25, %v2837_v28  ;;  %v1763_v56 = vrot.slane %v1761_v11, 1 }
 0x6b8   :  { %v1739_v45 = vrot.slane %v1737_v33, 2  ;;  %v1758_v47 = vrot.slane %v1756_v36, 3  ;;  %v1770_v48 = vrot.slane %v1768_v42, 4  ;;  %v1746_v54 = vrot.slane %v1744_v34, 2 }
 0x6b9   :  { %v1782_v50 = vmul.f32 %v1780_v29, %v1774_v43  ;;  %v1786_v51 = vmul.f32 %v1784_v39, %v1774_v43  ;;  %v1790_v52 = vmul.f32 %v1788_v40, %v1774_v43  ;;  %v1751_v3 = vrot.slane %v1749_v46, 4 }
 0x6ba   :  { %v1741_v53 = vadd.f32 %v1739_v45, %v2847_v38  ;;  %v1760_v55 = vadd.f32 %v1758_v47, %v2847_v38  ;;  %v2902_v58 = vadd.f32 %v1770_v48, %v2847_v38  ;;  %v1668_v29 = vrot.slane %v1666_v14, 6 }
 0x6bb   :  { %v1783_v59 = vadd.f32 1.0, %v1782_v50  ;;  %v1787_v60 = vadd.f32 1.0, %v1786_v51  ;;  %v1791_v62 = vadd.f32 1.0, %v1790_v52 }
 0x6bc   :  { %v1748_v2 = vadd.f32 %v1746_v54, %v1741_v53  ;;  %v2904_v4 = vadd.f32 %v1763_v56, %v1760_v55  ;;  %v1806_v5 = vrot.slane %v2902_v58, 1  ;;  %v1670_v11 = vadd.f32 %v1668_v29, %v2809_v63 }
 0x6bd   :  { %v1792_v1 = vsel %vm1729_vm6, %v1783_v59, %v1787_v60  ;;  %v1651_v53 = vrot.slane %v2851_v41, 2 }
 0x6be   :  { %v2909_v6 = vadd.f32 %v1751_v3, %v1748_v2  ;;  %v1793_v7 = vsel %vm1731_vm7, %v1792_v1, %v1791_v62  ;;  %v1826_v38 = vrot.slane %v2904_v4, 6  ;;  %v1808_v8 = vmul.f32 %v2855_v49, %v1806_v5 }
 0x6bf   :  { %v1814_v9 = vrot.slane %v2904_v4, 2  ;;  %v1794_v43 = vand.u32 2147483647, %v1793_v7 }
 0x6c0   :  { %v1819_v10 = vrot.slane %v2909_v6, 3  ;;  %v1828_v12 = vmul.f32 %v2855_v49, %v1826_v38  ;;  %v1833_v13 = vrot.slane %v2909_v6, 1  ;;  %v1810_v15 = vrot.slane %v1808_v8, 2 }
 0x6c1   :  { %v1816_v22 = vmul.f32 %v1814_v9, %v2837_v28 }
 0x6c2   :  { %v1821_v16 = vmul.f32 %v1819_v10, %v2839_v30  ;;  %v1830_v17 = vrot.slane %v1828_v12, 2  ;;  %v1835_v18 = vmul.f32 %v1833_v13, %v2839_v30  ;;  %v1840_v19 = vmul.f32 %v2855_v49, %v1819_v10 }
 0x6c3   :  { %v1812_v21 = vadd.f32 %v1810_v15, %v2842_v35 }
 0x6c4   :  { %v1823_v23 = vrot.slane %v1821_v16, 6  ;;  %v1842_v24 = vrot.slane %v1840_v19, 2  ;;  %v1832_v26 = vadd.f32 %v1830_v17, %v2845_v37  ;;  %v1837_v27 = vrot.slane %v1835_v18, 6 }
 0x6c5   :  { %v1817_v25 = vadd.f32 %v1816_v22, %v1812_v21 }
 0x6c6   :  { %v1844_v31 = vadd.f32 %v1842_v24, %v2845_v37  ;;  %v1839_v34 = vadd.f32 %v1837_v27, %v1832_v26  ;;  %v1901_v37 = vrot.slane %v2868_v61, 5  ;;  %v1648_v24 = vmul.f32 %v2879_v20, %v2879_v20 }
 0x6c7   :  { %v1825_v32 = vadd.f32 %v1823_v23, %v1817_v25 }
 0x6c8   :  { %v1849_v33 = vrot.slane %v1844_v31, 1 }
 0x6c9   :  { %v1846_v36 = vrot.slane %v1825_v32, 7 }
 0x6cb   :  { %v1851_v49 = vsel %vm1729_vm6, %v1846_v36, %v1839_v34 }
 0x6cc   :  { %v1852_v35 = vsel %vm1731_vm7, %v1851_v49, %v1849_v33 }
 0x6cd   :  { %2339 = vtanh.f32 %v1852_v35 }
 0x6ce   :  { %2341 = vtanh.f32 %v1670_v11 }
 0x6cf   :  { %2343 = vlog2.f32 %v1794_v43 }
 0x6da   :  { %v2340_v42 = vpop.eup %2339 }
 0x6db   :  { %v2342_v45 = vpop.eup %2341  ;;  %v1855_v46 = vrot.slane %v2340_v42, 3  ;;  %v1862_v47 = vrot.slane %v2340_v42, 4  ;;  %v1869_v48 = vrot.slane %v2340_v42, 7  ;;  %v1876_v50 = vrot.slane %v2340_v42, 5 }
 0x6dc   :  { %v1883_v51 = vrot.slane %v2340_v42, 6  ;;  %v1895_v52 = vmul.f32 %v2340_v42, %v2340_v42  ;;  %v1673_v59 = vrot.slane %v2342_v45, 4  ;;  %v2344_v29 = vpop.eup %2343 }
 0x6dd   :  { %v1857_v63 = vmul.f32 %v2863_v57, %v1855_v46  ;;  %v1864_v54 = vmul.f32 %v2863_v57, %v1862_v47  ;;  %v1871_v55 = vmul.f32 %v1869_v48, %v2839_v30  ;;  %v1878_v56 = vmul.f32 %v2863_v57, %v1876_v50 }
 0x6de   :  { %v1885_v60 = vmul.f32 %v1883_v51, %v2837_v28  ;;  %v1890_v62 = vmul.f32 %v1876_v50, %v2837_v28  ;;  %v1896_v2 = vsub.f32 1.0, %v1895_v52  ;;  %v1677_v30 = vmul.f32 %v2342_v45, %v2342_v45 }
 0x6df   :  { %v1859_v3 = vrot.slane %v1857_v63, 7  ;;  %v1866_v0 = vrot.slane %v1864_v54, 4  ;;  %v1880_v1 = vrot.slane %v1878_v56, 1  ;;  %v1873_v5 = vrot.slane %v1871_v55, 2 }
 0x6e0   :  { %v1897_v7 = vmul.f32 %v1896_v2, %v1784_v39  ;;  %v1899_v38 = vmul.f32 %v1896_v2, %v1788_v40  ;;  %v1887_v9 = vrot.slane %v1885_v60, 1  ;;  %v1903_v10 = vmul.f32 %v1901_v37, %v1896_v2 }
 0x6e1   :  { %v1868_v57 = vadd.f32 %v1866_v0, %v2904_v4  ;;  %v1882_v8 = vadd.f32 %v1880_v1, %v2902_v58  ;;  %v1675_v28 = vmul.f32 %v2851_v41, %v1673_v59  ;;  %v1892_v12 = vrot.slane %v1890_v62, 3 }
 0x6e2   :  { %v1898_v13 = vadd.f32 1.0, %v1897_v7  ;;  %v1900_v14 = vadd.f32 1.0, %v1899_v38  ;;  %v1861_v15 = vadd.f32 %v1859_v3, %v2909_v6  ;;  %v1904_v39 = vadd.f32 1.0, %v1903_v10 }
 0x6e3   :  { %v1875_v16 = vadd.f32 %v1873_v5, %v1868_v57  ;;  %v1889_v17 = vadd.f32 %v1887_v9, %v1882_v8  ;;  %v1653_v58 = vmul.f32 %v2851_v41, %v1651_v53  ;;  %v1676_v19 = vadd.f32 %v1675_v28, %v2892_v44 }
 0x6e4   :  { %v1905_v61 = vsel %vm1729_vm6, %v1898_v13, %v1900_v14  ;;  %v1678_v23 = vsub.f32 1.0, %v1677_v30  ;;  %v1649_v44 = vsub.f32 1.0, %v1648_v24  ;;  %v1796_v34 = vmul.f32 0.6931472, %v2344_v29 }
 0x6e5   :  { %v1894_v40 = vadd.f32 %v1892_v12, %v1889_v17  ;;  %v1906_v18 = vsel %vm1731_vm7, %v1905_v61, %v1904_v39  ;;  %v1918_v4 = vsel %vm1729_vm6, %v1861_v15, %v1875_v16  ;;  %v1655_v26 = vrot.slane %v1653_v58, 4 }
 0x6e6   :  { %v1907_v21 = vand.u32 2147483647, %v1906_v18  ;;  %v1798_v49 = vrot.slane %v1796_v34, 1  ;;  %v1801_v46 = vrot.slane %v1796_v34, 2 }
 0x6e7   :  { %v1919_v22 = vsel %vm1731_vm7, %v1918_v4, %v1894_v40  ;;  %v1679_v41 = vmul.f32 %v1678_v23, %v1655_v26  ;;  %v1657_v33 = vmul.f32 %v1655_v26, %v1649_v44 }
 0x6e8   :  { %v1921_v6 = vsel %vm1920_vm4, %v1919_v22, %v1676_v19  ;;  %2345 = vlog2.f32 %v1907_v21  ;;  %v1800_v43 = vadd.f32 %v1798_v49, %v1796_v34 }
 0x6e9   :  { %v1923_v25 = vand.u32 2147483647, %v1921_v6  ;;  %2011 = vst [vmem:[%s2988_s27] sm:$0xf] %v1921_v6  ;;  %v1680_v32 = vadd.f32 1.0, %v1679_v41  ;;  %v1658_v11 = vadd.f32 1.0, %v1657_v33  ;;  %v1922_v62 = vmax.f32 %v1921_v6, 0.0 }
 0x6ea   :  { %v1803_v37 = vadd.f32 %v1801_v46, %v1800_v43  ;;  %v1932_v3 = vrot.slane %v1921_v6, 5  ;;  %v1939_v0 = vrot.slane %v1921_v6, 1  ;;  %v1942_v9 = vrot.slane %v1921_v6, 2 }
 0x6eb   :  { %v1924_v27 = vsub.f32 0.0, %v1923_v25  ;;  %v1681_v36 = vand.u32 2147483647, %v1680_v32  ;;  %v1659_v42 = vand.u32 2147483647, %v1658_v11 }
 0x6ec   :  { %v1941_v30 = vadd.f32 %v1939_v0, %v1921_v6 }
 0x6ed   :  { %v1925_v31 = vmul.f32 1.442695, %v1924_v27 }
 0x6ee   :  { %v1944_v13 = vadd.f32 %v1942_v9, %v1941_v30 }
 0x6ef   :  { %2347 = vpow2.f32 %v1925_v31 }
 0x6f0   :  { %2349 = vlog2.f32 %v1681_v36 }
 0x6f1   :  { %2351 = vlog2.f32 %v1659_v42 }
 0x6f5   :  { %v2346_v20 = vpop.eup %2345 }
 0x6f6   :  { %v1909_v35 = vmul.f32 0.6931472, %v2346_v20 }
 0x6f8   :  { %v1911_v45 = vrot.slane %v1909_v35, 1  ;;  %v1914_v48 = vrot.slane %v1909_v35, 2 }
 0x6fa   :  { %v1913_v47 = vadd.f32 %v1911_v45, %v1909_v35 }
 0x6fc   :  { %v2348_v50 = vpop.eup %2347  ;;  %v1916_v51 = vadd.f32 %v1914_v48, %v1913_v47 }
 0x6fd   :  { %v1927_v52 = vadd.f32 1.0, %v2348_v50  ;;  %v2350_v63 = vpop.eup %2349 }
 0x6fe   :  { %v1917_v53 = vadd.f32 %v1916_v51, %v1803_v37  ;;  %v1683_v54 = vmul.f32 0.6931472, %v2350_v63  ;;  %v2352_v55 = vpop.eup %2351 }
 0x6ff   :  { %2353 = vlog2.f32 %v1927_v52  ;;  %v1661_v60 = vmul.f32 0.6931472, %v2352_v55 }
 0x700   :  { %v1685_v56 = vrot.slane %v1683_v54, 1  ;;  %v1945_v15 = vadd.f32 %v1944_v13, %v1917_v53 }
 0x702   :  { %v1687_v1 = vadd.f32 %v1685_v56, %v1661_v60 }
 0x704   :  { %v1934_v7 = vadd.f32 %v1932_v3, %v1687_v1 }
 0x70c   :  { %v2354_v59 = vpop.eup %2353 }
 0x70d   :  { %v1929_v2 = vmul.f32 0.6931472, %v2354_v59 }
 0x70f   :  { %v1930_v5 = vadd.f32 %v1929_v2, %v1922_v62 }
 0x711   :  { %v1936_v38 = vrot.slane %v1930_v5, 5  ;;  %v1946_v57 = vrot.slane %v1930_v5, 1  ;;  %v1949_v28 = vrot.slane %v1930_v5, 2 }
 0x713   :  { %v1938_v8 = vsub.f32 %v1934_v7, %v1936_v38  ;;  %v1948_v10 = vadd.f32 %v1946_v57, %v1930_v5 }
 0x715   :  { %v1980_v12 = vsel %vm1979_vm8, %v1938_v8, 0.0  ;;  %v1951_v14 = vadd.f32 %v1949_v28, %v1948_v10 }
 0x716   :  { %1981 = vadd.xlane.f32.xlu1 %v1980_v12 }
 0x717   :  { %v1952_v16 = vmul.f32 2.0, %v1951_v14 }
 0x719   :  { %v1953_v17 = vsub.f32 %v1945_v15, %v1952_v16 }
 0x71b   :  { %v2003_v39 = vsel %vm1729_vm6, %v1953_v17, 0.0 }
 0x71c   :  { %2004 = vadd.xlane.f32.xlu0 %v2003_v39 }
 0x726   :  { %v1990_v61 = vpop.xlane.xlu0 %1989 }
 0x727   :  { %v1992_v40 = vrot.slane %v1990_v61, 1  ;;  %v1995_v4 = vrot.slane %v1990_v61, 2 }
 0x729   :  { %v1994_v18 = vadd.f32 %v1992_v40, %v1990_v61 }
 0x72a   :  { %v1977_v19 = vpop.xlane.xlu0 %1976 }
 0x72b   :  { %v1997_v58 = vadd.f32 %v1995_v4, %v1994_v18  ;;  %v1978_v6 = vmul.f32 0.0078125, %v1977_v19 }
 0x72d   :  { %v1998_v23 = vmul.f32 0.0026041667, %v1997_v58 }
 0x72f   :  { %v2000_v27 = vrot.slane %v1998_v23, 5 }
 0x79f   :  { %v1982_v21 = vpop.xlane.xlu1 %1981 }
 0x7a0   :  { %v1983_v22 = vmul.f32 0.0078125, %v1982_v21 }
 0x7a2   :  { %v1985_v24 = vrot.slane %v1983_v22, 3 }
 0x7a4   :  { %v1987_v25 = vsub.f32 %v1978_v6, %v1985_v24 }
 0x7a5   :  { %v2005_v26 = vpop.xlane.xlu0 %2004 }
 0x7a6   :  { %v2006_v41 = vmul.f32 0.0078125, %v2005_v26  ;;  %v2002_v29 = vadd.f32 %v2000_v27, %v1987_v25 }
 0x7a8   :  { %v2008_v44 = vrot.slane %v2006_v41, 5 }
 0x7aa   :  { %v2010_v31 = vsub.f32 %v2002_v29, %v2008_v44 }
 0x7ac   :  { %2014 = vperm.xlu1 %2324, %v2010_v31  }
 0x827   :  { %v2015_v32 = vpop.permute.xlu1 %2014 }
 0x828   :  { %2017 = vst [vmem:[%s2988_s27 + $0x1] sm:$0x8] %v2015_v32 }

</bundles_post_ra>
